<compile_context>
chip_gen: v7x
topology: tpu7x:2x2x1
jax: 0.10.0
libtpu: 0.0.40
codegen_flags: <defaults>
</compile_context>

<pallas_src>
import functools

import jax
import jax.numpy as jnp
from jax.experimental import pallas as pl
from jax.experimental.pallas import tpu as pltpu

CP = 128     # lane-dense padded channel count for conv2..conv4 outputs
LPAD = 8     # left pad (W) of VMEM scratch -> sublane-aligned interiors


# --------------------------------------------------------------------------
# Fused 4-layer kernel (one grid step == Nb batch elements)
# --------------------------------------------------------------------------
def _encoder_kernel(s4p_ref, w1_ref, w2_ref, w3_ref, w4_ref,
                    b1_ref, b2_ref, b3_ref, b4_ref,
                    out_ref, t1p_ref, pbuf_ref, *, Nb, HB, WB, H):
    """Fused conv1..conv4 (+ReLU) for Nb images.

    s4p_ref : (Nb, HB+1, WB+1, 16*cin) bf16  space-to-depth(4) input, 1 pad top/left
    w1_ref  : (64*cin, 4*H)            bf16  conv1 as ONE matmul (taps K-concat,
                                             output sub-positions N-concat)
    w2_ref  : (16*H, CP)               bf16  conv2, 4 taps K-concat, Cout padded
    w3_ref  : (9*CP, CP)               bf16  conv3, 9 taps K-concat, padded
    w4_ref  : (9*CP, CP)               bf16  conv4, 9 taps K-concat, padded
    b*_ref  : (1, 4H) / (1, CP)        f32   biases
    out_ref : (Nb, HB, WB, CP)         bf16  final activation (CP-padded channels)
    t1p_ref : (Nb, HB+1, LPAD+WB, 4H)  bf16  conv1 out in space-to-depth(2) layout
    pbuf_ref: (Nb, HB+2, LPAD+WB+1, CP) bf16 padded conv3/conv4 input
    """
    f32 = jnp.float32
    bf16 = jnp.bfloat16
    M = Nb * HB * WB
    H4 = 4 * H
    C64 = w1_ref.shape[0]
    CPk = pbuf_ref.shape[3]
    Wt = LPAD + WB           # t1p W extent
    Wp = LPAD + WB + 1       # pbuf W extent

    # Zero only the pad-border slivers (interiors are fully rewritten below).
    t1p_ref[:, 0:1, :, :] = jnp.zeros((Nb, 1, Wt, H4), bf16)
    t1p_ref[:, :, 0:LPAD, :] = jnp.zeros((Nb, HB + 1, LPAD, H4), bf16)
    pbuf_ref[:, 0:1, :, :] = jnp.zeros((Nb, 1, Wp, CPk), bf16)
    pbuf_ref[:, HB + 1:HB + 2, :, :] = jnp.zeros((Nb, 1, Wp, CPk), bf16)
    pbuf_ref[:, :, 0:LPAD, :] = jnp.zeros((Nb, HB + 2, LPAD, CPk), bf16)
    # (pbuf's right pad column is written together with the interior stores)

    # ---------------- conv1: 3x3 stride-2, cin -> H (one matmul) ------------
    x1 = jnp.concatenate(
        [s4p_ref[:, iey:iey + HB, iex:iex + WB, :]
         for iey in range(2) for iex in range(2)], axis=-1).reshape(M, C64)
    a1 = jnp.dot(x1, w1_ref[...], preferred_element_type=f32)
    a1 = jnp.maximum(a1 + b1_ref[...], 0.0)                       # (M, 4H) f32
    t1p_ref[:, 1:HB + 1, LPAD:Wt, :] = (
        a1.astype(bf16).reshape(Nb, HB, WB, H4))                  # dense store

    # ---------------- conv2: 3x3 stride-2, H -> H (one matmul, K=16H) -------
    x2 = jnp.concatenate(
        [t1p_ref[:, iey:iey + HB, LPAD - 1 + iex:LPAD - 1 + iex + WB, :]
         for iey in range(2) for iex in range(2)], axis=-1).reshape(M, 4 * H4)
    o2 = jnp.dot(x2, w2_ref[...], preferred_element_type=f32)
    o2 = jnp.maximum(o2 + b2_ref[...], 0.0)                       # (M, CP)
    zcol = jnp.zeros((Nb, HB, 1, CPk), bf16)
    pbuf_ref[:, 1:HB + 1, LPAD:Wp, :] = jnp.concatenate(
        [o2.astype(bf16).reshape(Nb, HB, WB, CPk), zcol], axis=2)

    # ---------------- conv3: 3x3 stride-1, H -> H (one matmul, K=9*CP) ------
    x3 = jnp.concatenate(
        [pbuf_ref[:, dy:dy + HB, LPAD - 1 + dx:LPAD - 1 + dx + WB, :]
         for dy in range(3) for dx in range(3)], axis=-1).reshape(M, 9 * CPk)
    o3 = jnp.dot(x3, w3_ref[...], preferred_element_type=f32)
    o3 = jnp.maximum(o3 + b3_ref[...], 0.0)
    pbuf_ref[:, 1:HB + 1, LPAD:Wp, :] = jnp.concatenate(
        [o3.astype(bf16).reshape(Nb, HB, WB, CPk), zcol], axis=2)

    # ---------------- conv4: 3x3 stride-1, H -> vqD (one matmul) ------------
    x4 = jnp.concatenate(
        [pbuf_ref[:, dy:dy + HB, LPAD - 1 + dx:LPAD - 1 + dx + WB, :]
         for dy in range(3) for dx in range(3)], axis=-1).reshape(M, 9 * CPk)
    o4 = jnp.dot(x4, w4_ref[...], preferred_element_type=f32)
    o4 = jnp.maximum(o4 + b4_ref[...], 0.0)
    out_ref[...] = o4.astype(out_ref.dtype).reshape(Nb, HB, WB, CPk)


# --------------------------------------------------------------------------
# Wrapper-side weight re-packing (cheap layout plumbing, done once per call;
# in a real model this would be cached at parameter-load time)
# --------------------------------------------------------------------------
def _build_effective_weights(params, cin):
    (w1, b1), (w2, b2), (w3, b3), (w4, b4) = params
    H = w1.shape[0]
    vqD = w4.shape[0]

    # conv1 (stride 2) over the space-to-depth(4) input, fused into ONE matmul:
    #   rows:    tap*16*cin + (qy*4+qx)*cin + ci     (tap = iey*2 + iex)
    #   columns: sub*H + co                          (sub = ay*2 + ax)
    w1t = jnp.transpose(w1, (2, 3, 1, 0))              # (3,3,cin,H) = (dy,dx,ci,co)
    w1e = jnp.zeros((4, 4, 16 * cin, H), jnp.float32)
    for ay in range(2):
        for ax in range(2):
            for dy in range(3):
                for dx in range(3):
                    ry, rx = 2 * ay + dy - 1, 2 * ax + dx - 1
                    iey, qy = (0, 3) if ry < 0 else (1, ry)
                    iex, qx = (0, 3) if rx < 0 else (1, rx)
                    q0 = (qy * 4 + qx) * cin
                    w1e = w1e.at[ay * 2 + ax, iey * 2 + iex,
                                 q0:q0 + cin, :].set(w1t[dy, dx])
    w1cat = jnp.transpose(w1e, (1, 2, 0, 3)).reshape(64 * cin, 4 * H)
    b1cat = jnp.tile(b1, 4).reshape(1, 4 * H)

    # conv2 (stride 2) over the space-to-depth(2) conv1 output, taps K-concat:
    #   rows: tap*4H + (py*2+px)*H + ci   (tap = iey*2 + iex), cols padded to CP
    w2t = jnp.transpose(w2, (2, 3, 1, 0))              # (3,3,H,H)
    w2e = jnp.zeros((2, 2, 4 * H, CP), jnp.float32)
    dmap = {(0, 1): 0, (1, 0): 1, (1, 1): 2}           # (offset, parity) -> dy
    for iey in range(2):
        for iex in range(2):
            for py in range(2):
                for px in range(2):
                    dy = dmap.get((iey, py))
                    dx = dmap.get((iex, px))
                    if dy is None or dx is None:
                        continue
                    r0 = (py * 2 + px) * H
                    w2e = w2e.at[iey, iex, r0:r0 + H, :H].set(w2t[dy, dx])
    w2cat = w2e.reshape(16 * H, CP)

    # conv3 / conv4 (stride 1): 9 taps K-concat, Cin/Cout zero-padded to CP.
    def pack33(w, ci, co):
        wt = jnp.transpose(w, (2, 3, 1, 0))            # (3,3,ci,co)
        we = jnp.zeros((3, 3, CP, CP), jnp.float32).at[:, :, :ci, :co].set(wt)
        return we.reshape(9 * CP, CP)

    w3cat = pack33(w3, H, H)
    w4cat = pack33(w4, H, vqD)

    b2p = jnp.zeros((CP,), jnp.float32).at[:H].set(b2).reshape(1, CP)
    b3p = jnp.zeros((CP,), jnp.float32).at[:H].set(b3).reshape(1, CP)
    b4p = jnp.zeros((CP,), jnp.float32).at[:vqD].set(b4).reshape(1, CP)

    bf = jnp.bfloat16
    weights = (w1cat.astype(bf), w2cat.astype(bf), w3cat.astype(bf),
               w4cat.astype(bf))
    biases = (b1cat, b2p, b3p, b4p)
    return weights, biases


def _pick_batch_block(n, m_img):
    """Nb images folded into the matmul M dim per grid step (target M>=512),
    while keeping >=2 grid steps when N>=2 so both v7x TCs get work."""
    want = max(1, -(-512 // m_img))
    if n >= 2:
        want = min(want, n // 2)
    want = max(1, min(want, n))
    for d in range(want, 0, -1):
        if n % d == 0:
            return d
    return 1


# --------------------------------------------------------------------------
# Encoder: parameters + forward
# --------------------------------------------------------------------------
def init_encoder_params(key, hidden_size, vqD):
    """Deterministic synthetic init (shapes match the nn.Conv2d layers)."""
    specs = [
        (hidden_size, 1),            # conv1: 1 -> H
        (hidden_size, hidden_size),  # conv2: H -> H
        (hidden_size, hidden_size),  # conv3: H -> H
        (vqD, hidden_size),          # conv4: H -> vqD
    ]
    params = []
    for i, (cout, cin) in enumerate(specs):
        kw_, kb = jax.random.split(jax.random.fold_in(key, i))
        fan_in = cin * 9
        bound = 1.0 / jnp.sqrt(fan_in)
        w = jax.random.uniform(kw_, (cout, cin, 3, 3), jnp.float32, -bound, bound)
        b = jax.random.uniform(kb, (cout,), jnp.float32, -bound, bound)
        params.append((w, b))
    return params


@jax.jit
def encoder_forward(x_nchw, params):
    """x_nchw: (N, 1, Hi, Wi) float32 -> (N, vqD, Hi//4, Wi//4) float32."""
    N, cin, Hi, Wi = x_nchw.shape
    assert Hi % 4 == 0 and Wi % 4 == 0
    H = params[0][0].shape[0]
    vqD = params[3][0].shape[0]
    assert H <= CP and vqD <= CP
    HB, WB = Hi // 4, Wi // 4
    Nb = _pick_batch_block(N, HB * WB)

    # NCHW -> NHWC -> space-to-depth(4) -> zero pad 1 on top/left, cast bf16.
    x = jnp.transpose(x_nchw, (0, 2, 3, 1))            # (N, Hi, Wi, cin)
    x = x.reshape(N, HB, 4, WB, 4, cin)
    s4 = jnp.transpose(x, (0, 1, 3, 2, 4, 5)).reshape(N, HB, WB, 16 * cin)
    s4p = jnp.pad(s4, ((0, 0), (1, 0), (1, 0), (0, 0))).astype(jnp.bfloat16)

    (w1c, w2c, w3c, w4c), (b1c, b2p, b3p, b4p) = _build_effective_weights(
        params, cin)

    kernel = functools.partial(_encoder_kernel, Nb=Nb, HB=HB, WB=WB, H=H)

    flops = 2 * N * HB * WB * (64 * cin * 4 * H + 16 * H * CP + 2 * 9 * CP * CP)
    bytes_accessed = int(
        s4p.size * 2 + (w1c.size + w2c.size + w3c.size + w4c.size) * 2
        + N * HB * WB * CP * 2)

    out = pl.pallas_call(
        kernel,
        out_shape=jax.ShapeDtypeStruct((N, HB, WB, CP), jnp.bfloat16),
        grid_spec=pltpu.PrefetchScalarGridSpec(
            num_scalar_prefetch=0,
            grid=(N // Nb,),
            in_specs=[
                pl.BlockSpec((Nb, HB + 1, WB + 1, 16 * cin),
                             lambda g: (g, 0, 0, 0)),
                pl.BlockSpec((64 * cin, 4 * H), lambda g: (0, 0)),
                pl.BlockSpec((16 * H, CP), lambda g: (0, 0)),
                pl.BlockSpec((9 * CP, CP), lambda g: (0, 0)),
                pl.BlockSpec((9 * CP, CP), lambda g: (0, 0)),
                pl.BlockSpec((1, 4 * H), lambda g: (0, 0)),
                pl.BlockSpec((1, CP), lambda g: (0, 0)),
                pl.BlockSpec((1, CP), lambda g: (0, 0)),
                pl.BlockSpec((1, CP), lambda g: (0, 0)),
            ],
            out_specs=pl.BlockSpec((Nb, HB, WB, CP), lambda g: (g, 0, 0, 0)),
            scratch_shapes=[
                pltpu.VMEM((Nb, HB + 1, LPAD + WB, 4 * H), jnp.bfloat16),
                pltpu.VMEM((Nb, HB + 2, LPAD + WB + 1, CP), jnp.bfloat16),
            ],
        ),
        compiler_params=pltpu.CompilerParams(
            dimension_semantics=("parallel",),
            vmem_limit_bytes=32 * 1024 * 1024,
        ),
        cost_estimate=pl.CostEstimate(
            flops=flops, transcendentals=0, bytes_accessed=bytes_accessed),
    )(s4p, w1c, w2c, w3c, w4c, b1c, b2p, b3p, b4p)

    y = out[..., :vqD].astype(jnp.float32)             # strip Cout padding
    return jnp.transpose(y, (0, 3, 1, 2))              # NHWC -> NCHW


# --------------------------------------------------------------------------
# Pure-JAX reference (lax conv, f32) for the correctness check
# --------------------------------------------------------------------------
def encoder_forward_ref(x_nchw, params):
    x = x_nchw
    strides = (2, 2, 1, 1)
    for (w, b), s in zip(params, strides):
        x = jax.lax.conv_general_dilated(
            x, w, window_strides=(s, s), padding=((1, 1), (1, 1)),
            dimension_numbers=("NCHW", "OIHW", "NCHW"))
        x = jax.nn.relu(x + b[None, :, None, None])
    return x


if __name__ == "__main__":
    key = jax.random.PRNGKey(0)
    k_x, k_p = jax.random.split(key)

    N, H_img = 2, 16          # small MNIST-like single-channel image
    hidden_size, vqD = 32, 16

    x = jax.random.normal(k_x, (N, 1, H_img, H_img), jnp.float32)
    params = init_encoder_params(k_p, hidden_size, vqD)

    out = jax.block_until_ready(encoder_forward(x, params))
    ref = jax.block_until_ready(encoder_forward_ref(x, params))

    assert out.shape == (N, vqD, H_img // 4, H_img // 4), out.shape
    # bf16 MXU operands / bf16 output with f32 accumulation -> bf16 tolerance
    assert jnp.allclose(out, ref, atol=5e-2, rtol=5e-2), float(
        jnp.max(jnp.abs(out - ref)))

    print("KERNEL_OK")
</pallas_src>

<mosaic_0001>
module attributes {stable_mosaic.version = 11 : i64} {
  func.func @_encoder_kernel(%arg0: i32, %arg1: memref<1x5x5x16xbf16, #tpu.memory_space<vmem>>, %arg2: memref<64x128xbf16, #tpu.memory_space<vmem>>, %arg3: memref<512x128xbf16, #tpu.memory_space<vmem>>, %arg4: memref<1152x128xbf16, #tpu.memory_space<vmem>>, %arg5: memref<1152x128xbf16, #tpu.memory_space<vmem>>, %arg6: memref<1x128xf32, #tpu.memory_space<vmem>>, %arg7: memref<1x128xf32, #tpu.memory_space<vmem>>, %arg8: memref<1x128xf32, #tpu.memory_space<vmem>>, %arg9: memref<1x128xf32, #tpu.memory_space<vmem>>, %arg10: memref<1x4x4x128xbf16, #tpu.memory_space<vmem>>, %arg11: memref<1x5x12x128xbf16, #tpu.memory_space<vmem>>, %arg12: memref<1x6x13x128xbf16, #tpu.memory_space<vmem>>) attributes {dimension_semantics = [#tpu.dimension_semantics<parallel>], iteration_bounds = array<i64: 2>, scalar_prefetch = 0 : i64, scratch_operands = 2 : i64, tpu.core_type = #tpu.core_type<tc>, window_params = [{transform_indices = @transform_0, window_bounds = array<i64: 1, 5, 5, 16>}, {pipeline_mode = #tpu.pipeline_mode<synchronous>, transform_indices = @transform_1, window_bounds = array<i64: 64, 128>}, {pipeline_mode = #tpu.pipeline_mode<synchronous>, transform_indices = @transform_2, window_bounds = array<i64: 512, 128>}, {pipeline_mode = #tpu.pipeline_mode<synchronous>, transform_indices = @transform_3, window_bounds = array<i64: 1152, 128>}, {pipeline_mode = #tpu.pipeline_mode<synchronous>, transform_indices = @transform_4, window_bounds = array<i64: 1152, 128>}, {pipeline_mode = #tpu.pipeline_mode<synchronous>, transform_indices = @transform_5, window_bounds = array<i64: 1, 128>}, {pipeline_mode = #tpu.pipeline_mode<synchronous>, transform_indices = @transform_6, window_bounds = array<i64: 1, 128>}, {pipeline_mode = #tpu.pipeline_mode<synchronous>, transform_indices = @transform_7, window_bounds = array<i64: 1, 128>}, {pipeline_mode = #tpu.pipeline_mode<synchronous>, transform_indices = @transform_8, window_bounds = array<i64: 1, 128>}, {transform_indices = @transform_9, window_bounds = array<i64: 1, 4, 4, 128>}]} {
    %cst = arith.constant 0.000000e+00 : bf16
    %0 = vector.broadcast %cst : bf16 to vector<1x1x12x128xbf16>
    %c0 = arith.constant 0 : index
    %c0_0 = arith.constant 0 : index
    %c0_1 = arith.constant 0 : index
    %c0_2 = arith.constant 0 : index
    %1 = vector.load %arg11[%c0, %c0_0, %c0_1, %c0_2] : memref<1x5x12x128xbf16, #tpu.memory_space<vmem>>, vector<1x1x12x128xbf16>
    tpu.vector_store %arg11[%c0, %c0_0, %c0_1, %c0_2], %0 {strides = array<i32>} : memref<1x5x12x128xbf16, #tpu.memory_space<vmem>>, vector<1x1x12x128xbf16>,
    %cst_3 = arith.constant 0.000000e+00 : bf16
    %2 = vector.broadcast %cst_3 : bf16 to vector<1x5x8x128xbf16>
    %c0_4 = arith.constant 0 : index
    %c0_5 = arith.constant 0 : index
    %c0_6 = arith.constant 0 : index
    %c0_7 = arith.constant 0 : index
    %3 = vector.load %arg11[%c0_4, %c0_5, %c0_6, %c0_7] : memref<1x5x12x128xbf16, #tpu.memory_space<vmem>>, vector<1x5x8x128xbf16>
    tpu.vector_store %arg11[%c0_4, %c0_5, %c0_6, %c0_7], %2 {strides = array<i32>} : memref<1x5x12x128xbf16, #tpu.memory_space<vmem>>, vector<1x5x8x128xbf16>,
    %cst_8 = arith.constant 0.000000e+00 : bf16
    %4 = vector.broadcast %cst_8 : bf16 to vector<1x1x13x128xbf16>
    %c0_9 = arith.constant 0 : index
    %c0_10 = arith.constant 0 : index
    %c0_11 = arith.constant 0 : index
    %c0_12 = arith.constant 0 : index
    %5 = vector.load %arg12[%c0_9, %c0_10, %c0_11, %c0_12] : memref<1x6x13x128xbf16, #tpu.memory_space<vmem>>, vector<1x1x13x128xbf16>
    tpu.vector_store %arg12[%c0_9, %c0_10, %c0_11, %c0_12], %4 {strides = array<i32>} : memref<1x6x13x128xbf16, #tpu.memory_space<vmem>>, vector<1x1x13x128xbf16>,
    %cst_13 = arith.constant 0.000000e+00 : bf16
    %6 = vector.broadcast %cst_13 : bf16 to vector<1x1x13x128xbf16>
    %c0_14 = arith.constant 0 : index
    %c5 = arith.constant 5 : index
    %c0_15 = arith.constant 0 : index
    %c0_16 = arith.constant 0 : index
    %7 = vector.load %arg12[%c0_14, %c5, %c0_15, %c0_16] : memref<1x6x13x128xbf16, #tpu.memory_space<vmem>>, vector<1x1x13x128xbf16>
    tpu.vector_store %arg12[%c0_14, %c5, %c0_15, %c0_16], %6 {strides = array<i32>} : memref<1x6x13x128xbf16, #tpu.memory_space<vmem>>, vector<1x1x13x128xbf16>,
    %cst_17 = arith.constant 0.000000e+00 : bf16
    %8 = vector.broadcast %cst_17 : bf16 to vector<1x6x8x128xbf16>
    %c0_18 = arith.constant 0 : index
    %c0_19 = arith.constant 0 : index
    %c0_20 = arith.constant 0 : index
    %c0_21 = arith.constant 0 : index
    %9 = vector.load %arg12[%c0_18, %c0_19, %c0_20, %c0_21] : memref<1x6x13x128xbf16, #tpu.memory_space<vmem>>, vector<1x6x8x128xbf16>
    tpu.vector_store %arg12[%c0_18, %c0_19, %c0_20, %c0_21], %8 {strides = array<i32>} : memref<1x6x13x128xbf16, #tpu.memory_space<vmem>>, vector<1x6x8x128xbf16>,
    %c0_22 = arith.constant 0 : index
    %c0_23 = arith.constant 0 : index
    %c0_24 = arith.constant 0 : index
    %c0_25 = arith.constant 0 : index
    %10 = vector.load %arg1[%c0_22, %c0_23, %c0_24, %c0_25] : memref<1x5x5x16xbf16, #tpu.memory_space<vmem>>, vector<1x4x4x16xbf16>
    %c0_26 = arith.constant 0 : index
    %c0_27 = arith.constant 0 : index
    %c1 = arith.constant 1 : index
    %c0_28 = arith.constant 0 : index
    %11 = vector.load %arg1[%c0_26, %c0_27, %c1, %c0_28] : memref<1x5x5x16xbf16, #tpu.memory_space<vmem>>, vector<1x4x4x16xbf16>
    %c0_29 = arith.constant 0 : index
    %c1_30 = arith.constant 1 : index
    %c0_31 = arith.constant 0 : index
    %c0_32 = arith.constant 0 : index
    %12 = vector.load %arg1[%c0_29, %c1_30, %c0_31, %c0_32] : memref<1x5x5x16xbf16, #tpu.memory_space<vmem>>, vector<1x4x4x16xbf16>
    %c0_33 = arith.constant 0 : index
    %c1_34 = arith.constant 1 : index
    %c1_35 = arith.constant 1 : index
    %c0_36 = arith.constant 0 : index
    %13 = vector.load %arg1[%c0_33, %c1_34, %c1_35, %c0_36] : memref<1x5x5x16xbf16, #tpu.memory_space<vmem>>, vector<1x4x4x16xbf16>
    %14 = tpu.concatenate %10, %11, %12, %13 in 3 : vector<1x4x4x16xbf16>, vector<1x4x4x16xbf16>, vector<1x4x4x16xbf16>, vector<1x4x4x16xbf16> -> vector<1x4x4x64xbf16>
    %15 = vector.shape_cast %14 : vector<1x4x4x64xbf16> to vector<16x64xbf16>
    %c0_37 = arith.constant 0 : index
    %c0_38 = arith.constant 0 : index
    %16 = vector.load %arg2[%c0_37, %c0_38] : memref<64x128xbf16, #tpu.memory_space<vmem>>, vector<64x128xbf16>
    %cst_39 = arith.constant dense<0.000000e+00> : vector<16x128xf32>
    %17 = tpu.matmul %15, %16, %cst_39 {dimension_numbers = #tpu.dot_dimension_numbers<[1], [0], [0], [1], [0, 0, 1, 1], [], []>} : vector<16x64xbf16>, vector<64x128xbf16>, vector<16x128xf32> -> vector<16x128xf32>
    %c0_40 = arith.constant 0 : index
    %c0_41 = arith.constant 0 : index
    %18 = vector.load %arg6[%c0_40, %c0_41] : memref<1x128xf32, #tpu.memory_space<vmem>>, vector<1x128xf32>
    %19 = vector.broadcast %18 : vector<1x128xf32> to vector<16x128xf32>
    %20 = arith.addf %17, %19 : vector<16x128xf32>
    %cst_42 = arith.constant 0.000000e+00 : f32
    %21 = vector.broadcast %cst_42 : f32 to vector<16x128xf32>
    %22 = arith.maximumf %20, %21 : vector<16x128xf32>
    %23 = arith.truncf %22 : vector<16x128xf32> to vector<16x128xbf16>
    %24 = vector.shape_cast %23 : vector<16x128xbf16> to vector<1x4x4x128xbf16>
    %c0_43 = arith.constant 0 : index
    %c1_44 = arith.constant 1 : index
    %c8 = arith.constant 8 : index
    %c0_45 = arith.constant 0 : index
    %25 = vector.load %arg11[%c0_43, %c1_44, %c8, %c0_45] : memref<1x5x12x128xbf16, #tpu.memory_space<vmem>>, vector<1x4x4x128xbf16>
    tpu.vector_store %arg11[%c0_43, %c1_44, %c8, %c0_45], %24 {strides = array<i32>} : memref<1x5x12x128xbf16, #tpu.memory_space<vmem>>, vector<1x4x4x128xbf16>,
    %c0_46 = arith.constant 0 : index
    %c0_47 = arith.constant 0 : index
    %c7 = arith.constant 7 : index
    %c0_48 = arith.constant 0 : index
    %26 = vector.load %arg11[%c0_46, %c0_47, %c7, %c0_48] : memref<1x5x12x128xbf16, #tpu.memory_space<vmem>>, vector<1x4x4x128xbf16>
    %c0_49 = arith.constant 0 : index
    %c0_50 = arith.constant 0 : index
    %c8_51 = arith.constant 8 : index
    %c0_52 = arith.constant 0 : index
    %27 = vector.load %arg11[%c0_49, %c0_50, %c8_51, %c0_52] : memref<1x5x12x128xbf16, #tpu.memory_space<vmem>>, vector<1x4x4x128xbf16>
    %c0_53 = arith.constant 0 : index
    %c1_54 = arith.constant 1 : index
    %c7_55 = arith.constant 7 : index
    %c0_56 = arith.constant 0 : index
    %28 = vector.load %arg11[%c0_53, %c1_54, %c7_55, %c0_56] : memref<1x5x12x128xbf16, #tpu.memory_space<vmem>>, vector<1x4x4x128xbf16>
    %c0_57 = arith.constant 0 : index
    %c1_58 = arith.constant 1 : index
    %c8_59 = arith.constant 8 : index
    %c0_60 = arith.constant 0 : index
    %29 = vector.load %arg11[%c0_57, %c1_58, %c8_59, %c0_60] : memref<1x5x12x128xbf16, #tpu.memory_space<vmem>>, vector<1x4x4x128xbf16>
    %30 = tpu.concatenate %26, %27, %28, %29 in 3 : vector<1x4x4x128xbf16>, vector<1x4x4x128xbf16>, vector<1x4x4x128xbf16>, vector<1x4x4x128xbf16> -> vector<1x4x4x512xbf16>
    %31 = vector.shape_cast %30 : vector<1x4x4x512xbf16> to vector<16x512xbf16>
    %c0_61 = arith.constant 0 : index
    %c0_62 = arith.constant 0 : index
    %32 = vector.load %arg3[%c0_61, %c0_62] : memref<512x128xbf16, #tpu.memory_space<vmem>>, vector<512x128xbf16>
    %cst_63 = arith.constant dense<0.000000e+00> : vector<16x128xf32>
    %33 = tpu.matmul %31, %32, %cst_63 {dimension_numbers = #tpu.dot_dimension_numbers<[1], [0], [0], [1], [0, 0, 1, 1], [], []>} : vector<16x512xbf16>, vector<512x128xbf16>, vector<16x128xf32> -> vector<16x128xf32>
    %c0_64 = arith.constant 0 : index
    %c0_65 = arith.constant 0 : index
    %34 = vector.load %arg7[%c0_64, %c0_65] : memref<1x128xf32, #tpu.memory_space<vmem>>, vector<1x128xf32>
    %35 = vector.broadcast %34 : vector<1x128xf32> to vector<16x128xf32>
    %36 = arith.addf %33, %35 : vector<16x128xf32>
    %cst_66 = arith.constant 0.000000e+00 : f32
    %37 = vector.broadcast %cst_66 : f32 to vector<16x128xf32>
    %38 = arith.maximumf %36, %37 : vector<16x128xf32>
    %cst_67 = arith.constant 0.000000e+00 : bf16
    %39 = vector.broadcast %cst_67 : bf16 to vector<1x4x1x128xbf16>
    %40 = arith.truncf %38 : vector<16x128xf32> to vector<16x128xbf16>
    %41 = vector.shape_cast %40 : vector<16x128xbf16> to vector<1x4x4x128xbf16>
    %42 = tpu.concatenate %41, %39 in 2 : vector<1x4x4x128xbf16>, vector<1x4x1x128xbf16> -> vector<1x4x5x128xbf16>
    %c0_68 = arith.constant 0 : index
    %c1_69 = arith.constant 1 : index
    %c8_70 = arith.constant 8 : index
    %c0_71 = arith.constant 0 : index
    %43 = vector.load %arg12[%c0_68, %c1_69, %c8_70, %c0_71] : memref<1x6x13x128xbf16, #tpu.memory_space<vmem>>, vector<1x4x5x128xbf16>
    tpu.vector_store %arg12[%c0_68, %c1_69, %c8_70, %c0_71], %42 {strides = array<i32>} : memref<1x6x13x128xbf16, #tpu.memory_space<vmem>>, vector<1x4x5x128xbf16>,
    %c0_72 = arith.constant 0 : index
    %c0_73 = arith.constant 0 : index
    %c7_74 = arith.constant 7 : index
    %c0_75 = arith.constant 0 : index
    %44 = vector.load %arg12[%c0_72, %c0_73, %c7_74, %c0_75] : memref<1x6x13x128xbf16, #tpu.memory_space<vmem>>, vector<1x4x4x128xbf16>
    %c0_76 = arith.constant 0 : index
    %c0_77 = arith.constant 0 : index
    %c8_78 = arith.constant 8 : index
    %c0_79 = arith.constant 0 : index
    %45 = vector.load %arg12[%c0_76, %c0_77, %c8_78, %c0_79] : memref<1x6x13x128xbf16, #tpu.memory_space<vmem>>, vector<1x4x4x128xbf16>
    %c0_80 = arith.constant 0 : index
    %c0_81 = arith.constant 0 : index
    %c9 = arith.constant 9 : index
    %c0_82 = arith.constant 0 : index
    %46 = vector.load %arg12[%c0_80, %c0_81, %c9, %c0_82] : memref<1x6x13x128xbf16, #tpu.memory_space<vmem>>, vector<1x4x4x128xbf16>
    %c0_83 = arith.constant 0 : index
    %c1_84 = arith.constant 1 : index
    %c7_85 = arith.constant 7 : index
    %c0_86 = arith.constant 0 : index
    %47 = vector.load %arg12[%c0_83, %c1_84, %c7_85, %c0_86] : memref<1x6x13x128xbf16, #tpu.memory_space<vmem>>, vector<1x4x4x128xbf16>
    %c0_87 = arith.constant 0 : index
    %c1_88 = arith.constant 1 : index
    %c8_89 = arith.constant 8 : index
    %c0_90 = arith.constant 0 : index
    %48 = vector.load %arg12[%c0_87, %c1_88, %c8_89, %c0_90] : memref<1x6x13x128xbf16, #tpu.memory_space<vmem>>, vector<1x4x4x128xbf16>
    %c0_91 = arith.constant 0 : index
    %c1_92 = arith.constant 1 : index
    %c9_93 = arith.constant 9 : index
    %c0_94 = arith.constant 0 : index
    %49 = vector.load %arg12[%c0_91, %c1_92, %c9_93, %c0_94] : memref<1x6x13x128xbf16, #tpu.memory_space<vmem>>, vector<1x4x4x128xbf16>
    %c0_95 = arith.constant 0 : index
    %c2 = arith.constant 2 : index
    %c7_96 = arith.constant 7 : index
    %c0_97 = arith.constant 0 : index
    %50 = vector.load %arg12[%c0_95, %c2, %c7_96, %c0_97] : memref<1x6x13x128xbf16, #tpu.memory_space<vmem>>, vector<1x4x4x128xbf16>
    %c0_98 = arith.constant 0 : index
    %c2_99 = arith.constant 2 : index
    %c8_100 = arith.constant 8 : index
    %c0_101 = arith.constant 0 : index
    %51 = vector.load %arg12[%c0_98, %c2_99, %c8_100, %c0_101] : memref<1x6x13x128xbf16, #tpu.memory_space<vmem>>, vector<1x4x4x128xbf16>
    %c0_102 = arith.constant 0 : index
    %c2_103 = arith.constant 2 : index
    %c9_104 = arith.constant 9 : index
    %c0_105 = arith.constant 0 : index
    %52 = vector.load %arg12[%c0_102, %c2_103, %c9_104, %c0_105] : memref<1x6x13x128xbf16, #tpu.memory_space<vmem>>, vector<1x4x4x128xbf16>
    %53 = tpu.concatenate %44, %45, %46, %47, %48, %49, %50, %51, %52 in 3 : vector<1x4x4x128xbf16>, vector<1x4x4x128xbf16>, vector<1x4x4x128xbf16>, vector<1x4x4x128xbf16>, vector<1x4x4x128xbf16>, vector<1x4x4x128xbf16>, vector<1x4x4x128xbf16>, vector<1x4x4x128xbf16>, vector<1x4x4x128xbf16> -> vector<1x4x4x1152xbf16>
    %54 = vector.shape_cast %53 : vector<1x4x4x1152xbf16> to vector<16x1152xbf16>
    %c0_106 = arith.constant 0 : index
    %c0_107 = arith.constant 0 : index
    %55 = vector.load %arg4[%c0_106, %c0_107] : memref<1152x128xbf16, #tpu.memory_space<vmem>>, vector<1152x128xbf16>
    %cst_108 = arith.constant dense<0.000000e+00> : vector<16x128xf32>
    %56 = tpu.matmul %54, %55, %cst_108 {dimension_numbers = #tpu.dot_dimension_numbers<[1], [0], [0], [1], [0, 0, 1, 1], [], []>} : vector<16x1152xbf16>, vector<1152x128xbf16>, vector<16x128xf32> -> vector<16x128xf32>
    %c0_109 = arith.constant 0 : index
    %c0_110 = arith.constant 0 : index
    %57 = vector.load %arg8[%c0_109, %c0_110] : memref<1x128xf32, #tpu.memory_space<vmem>>, vector<1x128xf32>
    %58 = vector.broadcast %57 : vector<1x128xf32> to vector<16x128xf32>
    %59 = arith.addf %56, %58 : vector<16x128xf32>
    %cst_111 = arith.constant 0.000000e+00 : f32
    %60 = vector.broadcast %cst_111 : f32 to vector<16x128xf32>
    %61 = arith.maximumf %59, %60 : vector<16x128xf32>
    %62 = arith.truncf %61 : vector<16x128xf32> to vector<16x128xbf16>
    %63 = vector.shape_cast %62 : vector<16x128xbf16> to vector<1x4x4x128xbf16>
    %64 = tpu.concatenate %63, %39 in 2 : vector<1x4x4x128xbf16>, vector<1x4x1x128xbf16> -> vector<1x4x5x128xbf16>
    %c0_112 = arith.constant 0 : index
    %c1_113 = arith.constant 1 : index
    %c8_114 = arith.constant 8 : index
    %c0_115 = arith.constant 0 : index
    %65 = vector.load %arg12[%c0_112, %c1_113, %c8_114, %c0_115] : memref<1x6x13x128xbf16, #tpu.memory_space<vmem>>, vector<1x4x5x128xbf16>
    tpu.vector_store %arg12[%c0_112, %c1_113, %c8_114, %c0_115], %64 {strides = array<i32>} : memref<1x6x13x128xbf16, #tpu.memory_space<vmem>>, vector<1x4x5x128xbf16>,
    %c0_116 = arith.constant 0 : index
    %c0_117 = arith.constant 0 : index
    %c7_118 = arith.constant 7 : index
    %c0_119 = arith.constant 0 : index
    %66 = vector.load %arg12[%c0_116, %c0_117, %c7_118, %c0_119] : memref<1x6x13x128xbf16, #tpu.memory_space<vmem>>, vector<1x4x4x128xbf16>
    %c0_120 = arith.constant 0 : index
    %c0_121 = arith.constant 0 : index
    %c8_122 = arith.constant 8 : index
    %c0_123 = arith.constant 0 : index
    %67 = vector.load %arg12[%c0_120, %c0_121, %c8_122, %c0_123] : memref<1x6x13x128xbf16, #tpu.memory_space<vmem>>, vector<1x4x4x128xbf16>
    %c0_124 = arith.constant 0 : index
    %c0_125 = arith.constant 0 : index
    %c9_126 = arith.constant 9 : index
    %c0_127 = arith.constant 0 : index
    %68 = vector.load %arg12[%c0_124, %c0_125, %c9_126, %c0_127] : memref<1x6x13x128xbf16, #tpu.memory_space<vmem>>, vector<1x4x4x128xbf16>
    %c0_128 = arith.constant 0 : index
    %c1_129 = arith.constant 1 : index
    %c7_130 = arith.constant 7 : index
    %c0_131 = arith.constant 0 : index
    %69 = vector.load %arg12[%c0_128, %c1_129, %c7_130, %c0_131] : memref<1x6x13x128xbf16, #tpu.memory_space<vmem>>, vector<1x4x4x128xbf16>
    %c0_132 = arith.constant 0 : index
    %c1_133 = arith.constant 1 : index
    %c8_134 = arith.constant 8 : index
    %c0_135 = arith.constant 0 : index
    %70 = vector.load %arg12[%c0_132, %c1_133, %c8_134, %c0_135] : memref<1x6x13x128xbf16, #tpu.memory_space<vmem>>, vector<1x4x4x128xbf16>
    %c0_136 = arith.constant 0 : index
    %c1_137 = arith.constant 1 : index
    %c9_138 = arith.constant 9 : index
    %c0_139 = arith.constant 0 : index
    %71 = vector.load %arg12[%c0_136, %c1_137, %c9_138, %c0_139] : memref<1x6x13x128xbf16, #tpu.memory_space<vmem>>, vector<1x4x4x128xbf16>
    %c0_140 = arith.constant 0 : index
    %c2_141 = arith.constant 2 : index
    %c7_142 = arith.constant 7 : index
    %c0_143 = arith.constant 0 : index
    %72 = vector.load %arg12[%c0_140, %c2_141, %c7_142, %c0_143] : memref<1x6x13x128xbf16, #tpu.memory_space<vmem>>, vector<1x4x4x128xbf16>
    %c0_144 = arith.constant 0 : index
    %c2_145 = arith.constant 2 : index
    %c8_146 = arith.constant 8 : index
    %c0_147 = arith.constant 0 : index
    %73 = vector.load %arg12[%c0_144, %c2_145, %c8_146, %c0_147] : memref<1x6x13x128xbf16, #tpu.memory_space<vmem>>, vector<1x4x4x128xbf16>
    %c0_148 = arith.constant 0 : index
    %c2_149 = arith.constant 2 : index
    %c9_150 = arith.constant 9 : index
    %c0_151 = arith.constant 0 : index
    %74 = vector.load %arg12[%c0_148, %c2_149, %c9_150, %c0_151] : memref<1x6x13x128xbf16, #tpu.memory_space<vmem>>, vector<1x4x4x128xbf16>
    %75 = tpu.concatenate %66, %67, %68, %69, %70, %71, %72, %73, %74 in 3 : vector<1x4x4x128xbf16>, vector<1x4x4x128xbf16>, vector<1x4x4x128xbf16>, vector<1x4x4x128xbf16>, vector<1x4x4x128xbf16>, vector<1x4x4x128xbf16>, vector<1x4x4x128xbf16>, vector<1x4x4x128xbf16>, vector<1x4x4x128xbf16> -> vector<1x4x4x1152xbf16>
    %76 = vector.shape_cast %75 : vector<1x4x4x1152xbf16> to vector<16x1152xbf16>
    %c0_152 = arith.constant 0 : index
    %c0_153 = arith.constant 0 : index
    %77 = vector.load %arg5[%c0_152, %c0_153] : memref<1152x128xbf16, #tpu.memory_space<vmem>>, vector<1152x128xbf16>
    %cst_154 = arith.constant dense<0.000000e+00> : vector<16x128xf32>
    %78 = tpu.matmul %76, %77, %cst_154 {dimension_numbers = #tpu.dot_dimension_numbers<[1], [0], [0], [1], [0, 0, 1, 1], [], []>} : vector<16x1152xbf16>, vector<1152x128xbf16>, vector<16x128xf32> -> vector<16x128xf32>
    %c0_155 = arith.constant 0 : index
    %c0_156 = arith.constant 0 : index
    %79 = vector.load %arg9[%c0_155, %c0_156] : memref<1x128xf32, #tpu.memory_space<vmem>>, vector<1x128xf32>
    %80 = vector.broadcast %79 : vector<1x128xf32> to vector<16x128xf32>
    %81 = arith.addf %78, %80 : vector<16x128xf32>
    %cst_157 = arith.constant 0.000000e+00 : f32
    %82 = vector.broadcast %cst_157 : f32 to vector<16x128xf32>
    %83 = arith.maximumf %81, %82 : vector<16x128xf32>
    %84 = arith.truncf %83 : vector<16x128xf32> to vector<16x128xbf16>
    %85 = vector.shape_cast %84 : vector<16x128xbf16> to vector<1x4x4x128xbf16>
    %c0_158 = arith.constant 0 : index
    %c0_159 = arith.constant 0 : index
    %c0_160 = arith.constant 0 : index
    %c0_161 = arith.constant 0 : index
    %86 = vector.load %arg10[%c0_158, %c0_159, %c0_160, %c0_161] : memref<1x4x4x128xbf16, #tpu.memory_space<vmem>>, vector<1x4x4x128xbf16>
    tpu.vector_store %arg10[%c0_158, %c0_159, %c0_160, %c0_161], %85 {strides = array<i32>} : memref<1x4x4x128xbf16, #tpu.memory_space<vmem>>, vector<1x4x4x128xbf16>,
    return
  }
  func.func @transform_0(%arg0: i32) -> (i32, i32, i32, i32) {
    %c0_i32 = arith.constant 0 : i32
    %c0_i32_0 = arith.constant 0 : i32
    %c0_i32_1 = arith.constant 0 : i32
    %c0_i32_2 = arith.constant 0 : i32
    return %arg0, %c0_i32, %c0_i32_0, %c0_i32_1 : i32, i32, i32, i32
  }
  func.func @transform_1(%arg0: i32) -> (i32, i32) {
    %c0_i32 = arith.constant 0 : i32
    %c0_i32_0 = arith.constant 0 : i32
    %c0_i32_1 = arith.constant 0 : i32
    return %c0_i32, %c0_i32_0 : i32, i32
  }
  func.func @transform_2(%arg0: i32) -> (i32, i32) {
    %c0_i32 = arith.constant 0 : i32
    %c0_i32_0 = arith.constant 0 : i32
    %c0_i32_1 = arith.constant 0 : i32
    return %c0_i32, %c0_i32_0 : i32, i32
  }
  func.func @transform_3(%arg0: i32) -> (i32, i32) {
    %c0_i32 = arith.constant 0 : i32
    %c0_i32_0 = arith.constant 0 : i32
    %c0_i32_1 = arith.constant 0 : i32
    return %c0_i32, %c0_i32_0 : i32, i32
  }
  func.func @transform_4(%arg0: i32) -> (i32, i32) {
    %c0_i32 = arith.constant 0 : i32
    %c0_i32_0 = arith.constant 0 : i32
    %c0_i32_1 = arith.constant 0 : i32
    return %c0_i32, %c0_i32_0 : i32, i32
  }
  func.func @transform_5(%arg0: i32) -> (i32, i32) {
    %c0_i32 = arith.constant 0 : i32
    %c0_i32_0 = arith.constant 0 : i32
    %c0_i32_1 = arith.constant 0 : i32
    return %c0_i32, %c0_i32_0 : i32, i32
  }
  func.func @transform_6(%arg0: i32) -> (i32, i32) {
    %c0_i32 = arith.constant 0 : i32
    %c0_i32_0 = arith.constant 0 : i32
    %c0_i32_1 = arith.constant 0 : i32
    return %c0_i32, %c0_i32_0 : i32, i32
  }
  func.func @transform_7(%arg0: i32) -> (i32, i32) {
    %c0_i32 = arith.constant 0 : i32
    %c0_i32_0 = arith.constant 0 : i32
    %c0_i32_1 = arith.constant 0 : i32
    return %c0_i32, %c0_i32_0 : i32, i32
  }
  func.func @transform_8(%arg0: i32) -> (i32, i32) {
    %c0_i32 = arith.constant 0 : i32
    %c0_i32_0 = arith.constant 0 : i32
    %c0_i32_1 = arith.constant 0 : i32
    return %c0_i32, %c0_i32_0 : i32, i32
  }
  func.func @transform_9(%arg0: i32) -> (i32, i32, i32, i32) {
    %c0_i32 = arith.constant 0 : i32
    %c0_i32_0 = arith.constant 0 : i32
    %c0_i32_1 = arith.constant 0 : i32
    %c0_i32_2 = arith.constant 0 : i32
    return %arg0, %c0_i32, %c0_i32_0, %c0_i32_1 : i32, i32, i32, i32
  }
}

</mosaic_0001>

<bundles_post_ra>
// kernel: tile.8
= control target key start
LH: loop header
LB: loop body
LE: loop exit
PB: predicated region body
PF: predicated region fallthrough
CT: control target
= control target key end

     0   :  { %s22_s0 = inlined_call_operand.vmem [shape: f32[32], index: 0, kind: input, shape index: {}]   ;;  %s23_s1 = inlined_call_operand.vmem [shape: f32[4,32], index: 1, kind: output, shape index: {}]  }
   0x1   :  { %v4_v0 = vld [vmem:[%s22_s0] ss:$0 sm:$0xff] }
   0x2   :  { %5 = vst [vmem:[%s23_s1] sm:$0xf] %v4_v0 }

// kernel: tile.9
= control target key start
LH: loop header
LB: loop body
LE: loop exit
PB: predicated region body
PF: predicated region fallthrough
CT: control target
= control target key end

     0   :  { %vm7_vm0 = vcmask 261120   ;;  %s37_s8 = smov 32   ;;  %s38_s9 = smov 64   ;;  %vm13_vm1 = vcmask 1048320   ;;  %vm19_vm2 = vcmask 785920   ;;  %vm25_vm3 = vcmask 523520   ;;  %s55_s0 = inlined_call_operand.vmem [shape: f32[4,32], index: 0, kind: input, shape index: {}]   ;;  %s56_s1 = inlined_call_operand.vmem [shape: f32[1,128], index: 1, kind: output, shape index: {}]  }
   0x1   :  { %v4_v0 = vld [vmem:[%s55_s0] sm:$0xf]  ;;  %s36_s0 = smov 96  }
   0x2   :  { %5 = vst [vmem:[#allocation1] sm:$0xf] %v4_v0 }
   0x9   :  { %v10_v1 = vld [vmem:[#allocation1 + $0x3] sm:$0x1]   ;;  %v22_v2 = vld [vmem:[#allocation1 + $0x1] sm:$0x1]   ;;  %v6_v3 = vld [vmem:[#allocation1] sm:$0x1]  }
   0xa   :  { %11 = vrot.lane.b32.xlu0 %v10_v1, %s36_s0  ;;  %23 = vrot.lane.b32.xlu1 %v22_v2, %s37_s8  ;;  %v16_v4 = vld [vmem:[#allocation1 + $0x2] sm:$0x1]   ;;  %8 = vst.msk [vmem:[#allocation0] sm:$0x1] %vm7_vm0, %v6_v3  }
   0xe   :  { %17 = vrot.lane.b32.xlu0 %v16_v4, %s38_s9 }
  0x7c   :  { %v12_v5 = vpop.permute.xlu0 %11   ;;  %v24_v6 = vpop.permute.xlu1 %23  }
  0x7d   :  { %14 = vst.msk [vmem:[#allocation0] sm:$0x1] %vm13_vm1, %v12_v5  }
  0x80   :  { %v18_v7 = vpop.permute.xlu0 %17  }
  0x81   :  { %20 = vst.msk [vmem:[#allocation0] sm:$0x1] %vm19_vm2, %v18_v7  }
  0x82   :  { %26 = vst.msk [vmem:[#allocation0] sm:$0x1] %vm25_vm3, %v24_v6  }
  0x89   :  { %v30_v8 = vld [vmem:[#allocation0] sm:$0x1] }
  0x8a   :  { %32 = vst [vmem:[%s56_s1] sm:$0x1] %v30_v8 }

// kernel: encoder_forward.1
= control target key start
LH: loop header
LB: loop body
LE: loop exit
PB: predicated region body
PF: predicated region fallthrough
CT: control target
= control target key end

     0   :  { %s5832_s30 = smov 0   ;;  %s6986_s0 = inlined_call_operand.vmem [shape: bf16[2,5,5,16], index: 0, kind: input, shape index: {}]   ;;  %s6987_s1 = inlined_call_operand.vmem [shape: bf16[64,128], index: 1, kind: input, shape index: {}]   ;;  %s6988_s2 = inlined_call_operand.vmem [shape: bf16[512,128], index: 2, kind: input, shape index: {}]   ;;  %s6989_s3 = inlined_call_operand.vmem [shape: bf16[1152,128], index: 3, kind: input, shape index: {}]   ;;  %s6990_s4 = inlined_call_operand.vmem [shape: bf16[1152,128], index: 4, kind: input, shape index: {}]   ;;  %s6991_s5 = inlined_call_operand.vmem [shape: f32[1,128], index: 5, kind: input, shape index: {}]   ;;  %s6992_s6 = inlined_call_operand.vmem [shape: f32[1,128], index: 6, kind: input, shape index: {}]   ;;  %s6993_s7 = inlined_call_operand.vmem [shape: f32[1,128], index: 7, kind: input, shape index: {}]   ;;  %s6994_s8 = inlined_call_operand.vmem [shape: f32[1,128], index: 8, kind: input, shape index: {}]   ;;  %s6995_s9 = inlined_call_operand.vmem [shape: bf16[2,4,4,128], index: 9, kind: output, shape index: {}]  }
   0x1 LB: > { %s4804_s10 = sadd.s32 4294967295, %s5773_s30   ;;  %p4808_p0 = scmp.ge.s32.totalorder %s5773_s30, 1  ;;  %s5773_s30 = sphi %s5832_s30, %s19_s30  }
   0x2   : > { %p287_p1 = scmp.lt.s32.totalorder %s5773_s30, 3 }
   0x4   : > { %p288_p2 = pnand %p4808_p0, %p287_p1 }
   0x5   : > { %p323_p3 = scmp.lt.s32.totalorder (!%p288_p2), %s4804_s10, 1  ;;  %v5775_v2 = vmov (!%p288_p2), 0.0   ;;  %s5776_s15 = smov (!%p288_p2), 32   ;;  %v5499_v4 = vld [vmem:[%s6987_s1] sm:$0xff] (!%p288_p2)   ;;  %v5500_v38 = vld [vmem:[%s6987_s1 + $0x8] sm:$0xff] (!%p288_p2)   ;;  %v5501_v45 = vld [vmem:[%s6987_s1 + $0x10] sm:$0xff] (!%p288_p2)   ;;  %v547_v59 = vlaneseq (!%p288_p2) }
   0x6   : > { %291 = sbr.rel (%p288_p2) target bundleno = 1317 (0x525), region = 56  ;;  %5419 = vmatprep.subr.bf16.mxu0 (!%p288_p2), %v5775_v2  ;;  %s5777_s18 = smov (!%p288_p2), 16   ;;  %vm5778_vm0 = vmmov (!%p288_p2), 0   ;;  %v5502_v46 = vld [vmem:[%s6987_s1 + $0x18] sm:$0xff] (!%p288_p2)   ;;  %vm492_vm1 = vcmask (!%p288_p2), 130048   ;;  %vm505_vm2 = vcmask (!%p288_p2), 261120  }
   0x7   : > { %5420 = vmatpush3.bf16.msra.mxu0 (!%p288_p2), %v5499_v4  ;;  %5427 = vmatprep.mubr.msk.bf16.mxu0 (!%p288_p2), %vm5778_vm0, %v5775_v2  ;;  %s5779_s25 = smov (!%p288_p2), 48   ;;  %v5780_v61 = vmov (!%p288_p2), 1983009808   ;;  %vm514_vm3 = vcmask (!%p288_p2), 392192   ;;  %v548_v4 = vshrl.u32 (!%p288_p2), %v547_v59, 7  ;;  %vm583_vm4 = vcmask (!%p288_p2), 523264  }
   0x8   : > { %5421 = vmatprep.subr.bf16.mxu0 (!%p288_p2), %v5775_v2  ;;  %v545_v62 = vunpack.c.l.s4 (!%p288_p2), %v5780_v61  ;;  %v4832_v59 = vld [vmem:[%s6991_s5] ss:$0 sm:$0xff] (!%p288_p2)  ;;  %vm922_vm5 = vsmask.f32 (!%p288_p2), 256  ;;  %vm923_vm6 = vsmask.f32 (!%p288_p2), 2312 }
   0x9   : > { %vm924_vm7 = vmor (!%p288_p2), %vm922_vm5, %vm923_vm6  ;;  %vm925_vm8 = vsmask.f32 (!%p288_p2), 4368  ;;  %vm927_vm9 = vsmask.f32 (!%p288_p2), 6424  ;;  %vm342_vm12 = vcmask (!%p288_p2), 1042432   ;;  %vm1387_vm15 = vcmask (!%p288_p2), 1041408  }
   0xa   : > { %vm926_vm10 = vmor (!%p288_p2), %vm924_vm7, %vm925_vm8  ;;  %vm343_vm13 = vsmask.f32 (!%p288_p2), 2304 }
   0xb   : > { %5422 = vmatpush3.bf16.msra.mxu0 (!%p288_p2), %v5500_v38  ;;  %v5515_v38 = vld [vmem:[%s6988_s2 + $0x58] sm:$0xff] (!%p288_p2)   ;;  %vm6083_vm11 = vmor (!%p288_p2), %vm926_vm10, %vm927_vm9 }
   0xc   : > { %5423 = vmatprep.subr.bf16.mxu0 (!%p288_p2), %v5775_v2  ;;  %vm6099_vm14 = vmand (!%p288_p2), %vm342_vm12, %vm343_vm13 }
   0xd   : > { %s7001_s10 = smov (!%p323_p3, %s4804_s10), 1 }
   0xe   : > { %s5471_s11 = smul.u32 20, %s7001_s10 }
   0xf   : > { %5424 = vmatpush3.bf16.msra.mxu0 %v5501_v45  ;;  %v5522_v45 = vld [vmem:[%s6988_s2 + $0xa0] sm:$0xff]  }
  0x10   : > { %s5846_s14 = scalar_lea.vmem %s6986_s0, %s5471_s11  ;;  %5425 = vmatprep.subr.bf16.mxu0 %v5775_v2 }
  0x11   : > { %v5487_v0 = vld [vmem:[%s5846_s14 + $0x8] ss:$0 sps:$4 sm:$0x33]   ;;  %v5488_v1 = vld [vmem:[%s5846_s14 + $0x4] ss:$0 sps:$4 sm:$0x33]  }
  0x12   : > { %438 = vrot.lane.b32.xlu1 %v5487_v0, %s5776_s15  ;;  %v5489_v3 = vld [vmem:[%s5846_s14 + $0x10] ss:$0 sps:$4 sm:$0x33]   ;;  %436 = vrot.lane.b32.xlu0 %v5488_v1, %s5776_s15  ;;  %v5490_v5 = vld [vmem:[%s5846_s14 + $0xc] ss:$0 sps:$4 sm:$0x33]  }
  0x13   : > { %v5491_v6 = vld [vmem:[%s5846_s14 + $0x8] ss:$0 sps:$4 sm:$0x77]   ;;  %v5492_v7 = vld [vmem:[%s5846_s14] ss:$0 sps:$4 sm:$0x77]   ;;  %5426 = vmatpush3.bf16.msra.mxu0 %v5502_v46 }
  0x14   : > { %v403_v8 = vshrl.u32 %v5491_v6, 16  ;;  %v405_v9 = vshll.u32 %v5491_v6, 16  ;;  %v389_v10 = vshrl.u32 %v5492_v7, 16  ;;  %v391_v11 = vshll.u32 %v5492_v7, 16  ;;  %v359_v55 = vld [vmem:[%s5846_s14] sm:$0x3] }
  0x15   : > { %v5493_v12 = vld [vmem:[%s5846_s14 + $0xc] ss:$0 sps:$4 sm:$0x77]   ;;  %v5494_v14 = vld [vmem:[%s5846_s14 + $0x4] ss:$0 sps:$4 sm:$0x77]   ;;  %v546_v7 = vunpack.c.0.s8 %v545_v62 }
  0x16   : > { %442 = vrot.lane.b32.xlu1 %v5489_v3, %s5776_s15  ;;  %440 = vrot.lane.b32.xlu0 %v5490_v5, %s5776_s15  ;;  %v407_v13 = vrot.slane %v405_v9, 1  ;;  %v393_v15 = vrot.slane %v391_v11, 1  ;;  %v410_v16 = vshrl.u32 %v5493_v12, 16  ;;  %v412_v17 = vshll.u32 %v5493_v12, 16  ;;  %v360_v56 = vld [vmem:[%s5846_s14 + $0x4] sm:$0x3] }
  0x17   : > { %v5495_v18 = vld [vmem:[%s5846_s14 + $0x8] ss:$0 sps:$4 sm:$0x77]   ;;  %v396_v20 = vshrl.u32 %v5494_v14, 16  ;;  %v398_v21 = vshll.u32 %v5494_v14, 16 }
  0x18   : > { %v408_v19 = vor.u32 %v407_v13, %v403_v8  ;;  %v394_v22 = vor.u32 %v393_v15, %v389_v10  ;;  %v414_v23 = vrot.slane %v412_v17, 1  ;;  %v464_v24 = vshrl.u32 %v5495_v18, 16  ;;  %v5496_v26 = vld [vmem:[%s5846_s14 + $0x4] ss:$0 sps:$4 sm:$0x77]   ;;  %v5523_v46 = vld [vmem:[%s6988_s2 + $0x68] sm:$0xff]  }
  0x19   : > { %v466_v25 = vshll.u32 %v5495_v18, 16  ;;  %v400_v27 = vrot.slane %v398_v21, 1  ;;  %v5497_v28 = vld [vmem:[%s5846_s14 + $0x10] ss:$0 sps:$4 sm:$0x77]   ;;  %v457_v31 = vshrl.u32 %v5496_v26, 16  ;;  %v5891_v15 = vsub.s32 %v546_v7, %v548_v4 }
  0x1a   : > { %420 = vrot.lane.b32.xlu1 %v408_v19, %s5777_s18  ;;  %416 = vrot.lane.b32.xlu0 %v394_v22, %s5777_s18  ;;  %v415_v29 = vor.u32 %v414_v23, %v410_v16  ;;  %v459_v32 = vshll.u32 %v5496_v26, 16  ;;  %v5498_v33 = vld [vmem:[%s5846_s14 + $0xc] ss:$0 sps:$4 sm:$0x77]   ;;  %v480_v35 = vshll.u32 %v5497_v28, 16  ;;  %v478_v40 = vshrl.u32 %v5497_v28, 16 }
  0x1b   : > { %v468_v30 = vrot.slane %v466_v25, 1  ;;  %v401_v34 = vor.u32 %v400_v27, %v396_v20  ;;  %v473_v37 = vshll.u32 %v5498_v33, 16  ;;  %v471_v43 = vshrl.u32 %v5498_v33, 16  ;;  %v362_v58 = vld [vmem:[%s5846_s14 + $0xc] sm:$0x3]  ;;  %v5503_v26 = vld [vmem:[%s6988_s2 + $0x40] sm:$0xff]  }
  0x1c   : > { %v461_v36 = vrot.slane %v459_v32, 1  ;;  %v482_v41 = vrot.slane %v480_v35, 1  ;;  %v361_v1 = vld [vmem:[%s5846_s14 + $0x8] sm:$0x3]  ;;  %v5781_v25 = vmov 0   ;;  %v5504_v27 = vld [vmem:[%s6988_s2 + $0xc0] sm:$0xff]   ;;  %5181 = vmatprep.subr.bf16.mxu1 %v5503_v26 }
  0x1d   : > { %v469_v39 = vor.u32 %v468_v30, %v464_v24  ;;  %v475_v44 = vrot.slane %v473_v37, 1  ;;  %334 = vst [vmem:[#allocation2] sm:$0xf] %v5781_v25  ;;  %335 = vst [vmem:[#allocation2 + $0x4] sm:$0x3] %v5781_v25  ;;  %v5505_v28 = vld [vmem:[%s6988_s2] sm:$0xff]   ;;  %5203 = vmatprep.subr.bf16.mxu0 %v5504_v27 }
  0x1e   : > { %422 = vrot.lane.b32.xlu1 %v415_v29, %s5777_s18  ;;  %418 = vrot.lane.b32.xlu0 %v401_v34, %s5777_s18  ;;  %v462_v42 = vor.u32 %v461_v36, %v457_v31  ;;  %v483_v47 = vor.u32 %v482_v41, %v478_v40  ;;  %337 = vst [vmem:[#allocation2 + $0x8] sm:$0xf] %v5781_v25  ;;  %338 = vst [vmem:[#allocation2 + $0x10] sm:$0xf] %v5781_v25  ;;  %v5506_v29 = vld [vmem:[%s6988_s2 + $0x80] sm:$0xff]   ;;  %v5507_v30 = vld [vmem:[%s6988_s2 + $0x48] sm:$0xff]  }
  0x1f   : > { %v476_v48 = vor.u32 %v475_v44, %v471_v43  ;;  %339 = vst [vmem:[#allocation2 + $0x18] sm:$0xf] %v5781_v25  ;;  %340 = vst [vmem:[#allocation2 + $0x20] sm:$0xf] %v5781_v25  ;;  %v5508_v31 = vld [vmem:[%s6988_s2 + $0xc8] sm:$0xff]   ;;  %5182 = vmatpush3.bf16.msra.mxu1 %v5505_v28  ;;  %v5511_v34 = vld [vmem:[%s6988_s2 + $0x50] sm:$0xff]  }
  0x20   : > { %341 = vst [vmem:[#allocation3] sm:$0xf] %v5781_v25  ;;  %349 = vst [vmem:[#allocation3 + $0x28] sm:$0xf] %v5781_v25  ;;  %v5509_v32 = vld [vmem:[%s6988_s2 + $0x8] sm:$0xff]   ;;  %5183 = vmatprep.subr.bf16.mxu1 %v5507_v30  ;;  %v5512_v35 = vld [vmem:[%s6988_s2 + $0xd0] sm:$0xff]  }
  0x21   : > { %354 = vst [vmem:[#allocation3 + $0x8] sm:$0xf] %v5781_v25  ;;  %355 = vst [vmem:[#allocation3 + $0x10] sm:$0xf] %v5781_v25  ;;  %v5510_v33 = vld [vmem:[%s6988_s2 + $0x88] sm:$0xff]   ;;  %v5513_v36 = vld [vmem:[%s6988_s2 + $0x10] sm:$0xff]  }
  0x22   : > { %486 = vrot.lane.b32.xlu1 %v469_v39, %s5779_s25  ;;  %484 = vrot.lane.b32.xlu0 %v462_v42, %s5779_s25  ;;  %356 = vst [vmem:[#allocation3 + $0x18] sm:$0xf] %v5781_v25  ;;  %357 = vst [vmem:[#allocation3 + $0x20] sm:$0xf] %v5781_v25  ;;  %v5514_v37 = vld [vmem:[%s6988_s2 + $0x90] sm:$0xff]   ;;  %v5516_v39 = vld [vmem:[%s6988_s2 + $0xd8] sm:$0xff]  }
  0x23   : > { %336 = vst [vmem:[#allocation2] sm:$0xf] %v5781_v25  ;;  %353 = vst [vmem:[#allocation3] sm:$0xf] %v5781_v25  ;;  %5184 = vmatpush3.bf16.msra.mxu1 %v5509_v32  ;;  %v5517_v40 = vld [vmem:[%s6988_s2 + $0x18] sm:$0xff]   ;;  %v5519_v42 = vld [vmem:[%s6988_s2 + $0x60] sm:$0xff]  }
  0x24   : > { %358 = vst [vmem:[#allocation3 + $0x28] sm:$0xf] %v5781_v25  ;;  %5185 = vmatprep.subr.bf16.mxu1 %v5511_v34  ;;  %v5518_v41 = vld [vmem:[%s6988_s2 + $0x98] sm:$0xff]   ;;  %v5520_v43 = vld [vmem:[%s6988_s2 + $0xe0] sm:$0xff]  }
  0x25   : > { %v5521_v44 = vld [vmem:[%s6988_s2 + $0x20] sm:$0xff]   ;;  %v6009_v26 = vld [vmem:[#allocation2 + $0x8] sm:$0x8]  ;;  %v6021_v32 = vld [vmem:[#allocation2 + $0x10] sm:$0x8] }
  0x26   : > { %490 = vrot.lane.b32.xlu1 %v483_v47, %s5779_s25  ;;  %488 = vrot.lane.b32.xlu0 %v476_v48, %s5779_s25  ;;  %v5524_v47 = vld [vmem:[%s6988_s2 + $0xe8] sm:$0xff]   ;;  %v6013_v28 = vld [vmem:[#allocation2 + $0x18] sm:$0x8]  ;;  %s5175_s25 = sshll.u32 %s7001_s10, 3 }
  0x27   : > { %5186 = vmatpush3.bf16.msra.mxu1 %v5513_v36  ;;  %v5525_v48 = vld [vmem:[%s6988_s2 + $0x28] sm:$0xff]   ;;  %s332_s28 = scalar_lea.vmem %s6995_s9, %s5175_s25 }
  0x28   : > { %5187 = vmatprep.subr.bf16.mxu1 %v5515_v38  ;;  %v6034_v38 = vld [vmem:[#allocation2 + $0x20] sm:$0x8] }
  0x2b   : > { %5188 = vmatpush3.bf16.msra.mxu1 %v5517_v40 }
  0x2c   : > { %5189 = vmatprep.subr.bf16.mxu1 %v5519_v42 }
  0x2f   : > { %5190 = vmatpush3.bf16.msra.mxu1 %v5521_v44 }
  0x30   : > { %5191 = vmatprep.subr.bf16.mxu1 %v5523_v46 }
  0x33   : > { %5192 = vmatpush3.bf16.msra.mxu1 %v5525_v48 }
  0x84   : > { %v439_v49 = vpop.permute.xlu1 %438  ;;  %v437_v50 = vpop.permute.xlu0 %436 }
  0x88   : > { %v443_v51 = vpop.permute.xlu1 %442  ;;  %v441_v52 = vpop.permute.xlu0 %440 }
  0x8c   : > { %v421_v53 = vpop.permute.xlu1 %420  ;;  %v417_v54 = vpop.permute.xlu0 %416 }
  0x8d   : > { %v495_v63 = vsel %vm492_vm1, %v359_v55, %v417_v54  ;;  %v501_v10 = vsel %vm492_vm1, %v361_v1, %v421_v53  ;;  %v5530_v53 = vld [vmem:[%s6988_s2 + $0xb0] sm:$0xff]   ;;  %v5531_v54 = vld [vmem:[%s6988_s2 + $0x78] sm:$0xff]  }
  0x8e   : > { %v507_v9 = vsel %vm505_vm2, %v495_v63, %v437_v50  ;;  %v511_v19 = vsel %vm505_vm2, %v501_v10, %v441_v52  ;;  %v5527_v50 = vld [vmem:[%s6988_s2 + $0x70] sm:$0xff]   ;;  %v5532_v55 = vld [vmem:[%s6988_s2 + $0xf8] sm:$0xff]  }
  0x8f   : > { %v5529_v52 = vld [vmem:[%s6988_s2 + $0x30] sm:$0xff]   ;;  %5193 = vmatprep.subr.bf16.mxu1 %v5527_v50 }
  0x90   : > { %v423_v57 = vpop.permute.xlu1 %422  ;;  %v419_v60 = vpop.permute.xlu0 %418  ;;  %5194 = vmatpush3.bf16.msra.mxu1 %v5529_v52 }
  0x91   : > { %v498_v0 = vsel %vm492_vm1, %v360_v56, %v419_v60  ;;  %v504_v5 = vsel %vm492_vm1, %v362_v58, %v423_v57  ;;  %v5533_v56 = vld [vmem:[%s6988_s2 + $0x38] sm:$0xff]   ;;  %5195 = vmatprep.subr.bf16.mxu1 %v5531_v54  ;;  %v659_v58 = vld [vmem:[#allocation2 + $0x4] sm:$0x3] }
  0x92   : > { %v509_v6 = vsel %vm505_vm2, %v498_v0, %v439_v49  ;;  %v513_v14 = vsel %vm505_vm2, %v504_v5, %v443_v51  ;;  %v5526_v49 = vld [vmem:[%s6988_s2 + $0xa8] sm:$0xff]   ;;  %v5528_v51 = vld [vmem:[%s6988_s2 + $0xf0] sm:$0xff]   ;;  %v5534_v57 = vld [vmem:[%s6988_s2 + $0xb8] sm:$0xff]   ;;  %v4845_v60 = vcombine.low %v659_v58, %v659_v58 }
  0x94   : > { %v487_v3 = vpop.permute.xlu1 %486  ;;  %v485_v8 = vpop.permute.xlu0 %484  ;;  %5196 = vmatpush3.bf16.msra.mxu1 %v5533_v56  ;;  %v699_v1 = vshrl.u32 %v4845_v60, 16 }
  0x95   : > { %v518_v11 = vsel %vm514_vm3, %v509_v6, %v487_v3  ;;  %v516_v12 = vsel %vm514_vm3, %v507_v9, %v485_v8  ;;  %v702_v3 = vshll.u32 %v4845_v60, 16 }
  0x96   : > { %v542_v16 = vcombine.low %v516_v12, %v518_v11  ;;  %v701_v8 = vrot.slane %v699_v1, 4  ;;  %v658_v12 = vld [vmem:[#allocation2] sm:$0x8] }
  0x97   : > { %v704_v9 = vrot.slane %v702_v3, 5 }
  0x98   : > { %v491_v13 = vpop.permute.xlu1 %490  ;;  %v489_v18 = vpop.permute.xlu0 %488  ;;  %v550_v22 = vrot.slane %v542_v16, %v5891_v15  ;;  %v4841_v16 = vcombine.low %v658_v12, %v659_v58 }
  0x99   : > { %v522_v17 = vsel %vm514_vm3, %v513_v14, %v491_v13  ;;  %v520_v20 = vsel %vm514_vm3, %v511_v19, %v489_v18 }
  0x9a   : > { %v543_v21 = vcombine.low %v520_v20, %v522_v17  ;;  %v705_v17 = vor.u32 %v704_v9, %v701_v8 }
  0x9c   : > { %v557_v23 = vrot.slane %v543_v21, %v5891_v15  ;;  %v4857_v20 = vcombine.low %v658_v12, %v705_v17  ;;  %v5999_v21 = vcombine.high %v4841_v16, %v705_v17 }
  0x9e   : > { %v558_v24 = vcombine.low %v550_v22, %v557_v23  ;;  %v6001_v22 = vld [vmem:[#allocation2 + $0x8] sm:$0x8]  ;;  %v6003_v23 = vld [vmem:[#allocation2 + $0x18] sm:$0x8]  ;;  %v6030_v36 = vrot.slane %v4857_v20, %v5891_v15 }
  0xa0   : > { %5428 = vmatmul.mubr.msk.bf16.vlgmr.msra.gmra.mrb[0].mxu0 %vm583_vm4, %v558_v24 }
  0xa1   : > { %5204 = vmatpush3.bf16.msra.mxu0 %v5506_v29 }
  0xa2   : > { %5205 = vmatprep.subr.bf16.mxu0 %v5508_v31 }
  0xa5   : > { %5206 = vmatpush3.bf16.msra.mxu0 %v5510_v33  ;;  %v6023_v33 = vld [vmem:[#allocation2 + $0x10] sm:$0x8] }
  0xa6   : > { %5207 = vmatprep.subr.bf16.mxu0 %v5512_v35 }
  0xa9   : > { %5208 = vmatpush3.bf16.msra.mxu0 %v5514_v37  ;;  %v803_v37 = vrot.slane %v5999_v21, %v5891_v15 }
  0xaa   : > { %5209 = vmatprep.subr.bf16.mxu0 %v5516_v39 }
  0xad   : > { %5210 = vmatpush3.bf16.msra.mxu0 %v5518_v41 }
  0xae   : > { %5211 = vmatprep.subr.bf16.mxu0 %v5520_v43 }
  0xb1   : > { %5212 = vmatpush3.bf16.msra.mxu0 %v5522_v45 }
  0xb2   : > { %5213 = vmatprep.subr.bf16.mxu0 %v5524_v47 }
  0xb5   : > { %5214 = vmatpush3.bf16.msra.mxu0 %v5526_v49 }
  0xb6   : > { %5215 = vmatprep.subr.bf16.mxu0 %v5528_v51 }
  0xb9   : > { %5216 = vmatpush3.bf16.msra.mxu0 %v5530_v53 }
  0xba   : > { %5217 = vmatprep.subr.bf16.mxu0 %v5532_v55 }
  0xbd   : > { %5218 = vmatpush3.bf16.msra.mxu0 %v5534_v57 }
 0x173   : > { %v621_v61 = vpop.f32.mrb[0].mxu0 }
 0x174   : > { %v622_v62 = vadd.f32 %v4832_v59, %v621_v61  ;;  %v5429_v63 = vpop.f32.mrb[1].mxu0 }
 0x175   : > { %v624_v0 = vpop.f32.mrb[2].mxu0 }
 0x176   : > { %v625_v4 = vadd.f32 %v4832_v59, %v624_v0  ;;  %v5430_v5 = vpop.f32.mrb[3].mxu0  ;;  %v628_v6 = vmax.f32 %v622_v62, 0.0 }
 0x178   : > { %v629_v7 = vmax.f32 %v625_v4, 0.0 }
 0x17a   : > { %v630_v10 = vpack.c.bf16 %v629_v7, %v628_v6  ;;  %v4838_v11 = vpack.c.bf16 %v629_v7, %v629_v7 }
 0x17c   : > { %v639_v13 = vrot.slane %v630_v10, %v5891_v15  ;;  %v646_v14 = vrot.slane %v4838_v11, %v5891_v15  ;;  %4839 = vst.sshfl [vmem:[#allocation2 + $0xc] sm:$0x3 pattern:$0x76325410] %v630_v10 }
 0x17d   : > { %4840 = vst.sshfl [vmem:[#allocation2 + $0x1c] sm:$0x3 pattern:$0x76325410] %v4838_v11 }
 0x17e   : > { %v647_v18 = vcombine.high %v639_v13, %v639_v13  ;;  %v648_v19 = vcombine.high %v646_v14, %v646_v14 }
 0x180   : > { %655 = vst [vmem:[#allocation2 + $0x14] sm:$0x3] %v647_v18  ;;  %657 = vst [vmem:[#allocation2 + $0x24] sm:$0x3] %v648_v19 }
 0x183   : > { %v6005_v24 = vld [vmem:[#allocation2 + $0xc] sm:$0x3] }
 0x184   : > { %v6007_v25 = vld [vmem:[#allocation2 + $0x1c] sm:$0x3]  ;;  %v6011_v27 = vld [vmem:[#allocation2 + $0xc] sm:$0x3]  ;;  %v4846_v30 = vcombine.low %v6005_v24, %v6005_v24  ;;  %v4842_v34 = vcombine.low %v6001_v22, %v6005_v24 }
 0x185   : > { %v6015_v29 = vld [vmem:[#allocation2 + $0x1c] sm:$0x3]  ;;  %v4848_v31 = vcombine.low %v6007_v25, %v6007_v25  ;;  %v4844_v35 = vcombine.low %v6003_v23, %v6007_v25  ;;  %v4849_v46 = vcombine.low %v6009_v26, %v6011_v27  ;;  %v4853_v48 = vcombine.low %v6011_v27, %v6011_v27 }
 0x186   : > { %v707_v39 = vshrl.u32 %v4846_v30, 16  ;;  %v710_v40 = vshll.u32 %v4846_v30, 16  ;;  %v4851_v47 = vcombine.low %v6013_v28, %v6015_v29  ;;  %v4855_v49 = vcombine.low %v6015_v29, %v6015_v29 }
 0x187   : > { %v723_v41 = vshrl.u32 %v4848_v31, 16  ;;  %v726_v42 = vshll.u32 %v4848_v31, 16  ;;  %v663_v43 = vld [vmem:[#allocation2 + $0x14] sm:$0x3]  ;;  %v6036_v45 = vld [vmem:[#allocation2 + $0x24] sm:$0x3] }
 0x188   : > { %v669_v44 = vld [vmem:[#allocation2 + $0x14] sm:$0x3]  ;;  %v4843_v50 = vcombine.low %v6021_v32, %v663_v43  ;;  %v4847_v51 = vcombine.low %v663_v43, %v663_v43  ;;  %v709_v52 = vrot.slane %v707_v39, 4  ;;  %v712_v53 = vrot.slane %v710_v40, 5 }
 0x189   : > { %v725_v54 = vrot.slane %v723_v41, 4  ;;  %v728_v55 = vrot.slane %v726_v42, 5  ;;  %v4850_v56 = vcombine.low %v6023_v33, %v669_v44  ;;  %v4852_v57 = vcombine.low %v6034_v38, %v6036_v45 }
 0x18a   : > { %v713_v58 = vor.u32 %v712_v53, %v709_v52  ;;  %v715_v59 = vshrl.u32 %v4847_v51, 16  ;;  %v718_v60 = vshll.u32 %v4847_v51, 16  ;;  %v4854_v61 = vcombine.low %v669_v44, %v669_v44 }
 0x18b   : > { %v729_v62 = vor.u32 %v728_v55, %v725_v54  ;;  %v4856_v63 = vcombine.low %v6036_v45, %v6036_v45  ;;  %v755_v0 = vshrl.u32 %v4853_v48, 16  ;;  %v758_v1 = vshll.u32 %v4853_v48, 16 }
 0x18c   : > { %v717_v3 = vrot.slane %v715_v59, 4  ;;  %v720_v4 = vrot.slane %v718_v60, 5  ;;  %v763_v5 = vshrl.u32 %v4854_v61, 16  ;;  %v766_v6 = vshll.u32 %v4854_v61, 16 }
 0x18d   : > { %v757_v7 = vrot.slane %v755_v0, 4  ;;  %v760_v8 = vrot.slane %v758_v1, 5  ;;  %v771_v9 = vshrl.u32 %v4855_v49, 16  ;;  %v774_v10 = vshll.u32 %v4855_v49, 16 }
 0x18e   : > { %v721_v11 = vor.u32 %v720_v4, %v717_v3  ;;  %v765_v12 = vrot.slane %v763_v5, 4  ;;  %v768_v13 = vrot.slane %v766_v6, 5  ;;  %v779_v14 = vshrl.u32 %v4856_v63, 16 }
 0x18f   : > { %v761_v16 = vor.u32 %v760_v8, %v757_v7  ;;  %v773_v17 = vrot.slane %v771_v9, 4  ;;  %v776_v18 = vrot.slane %v774_v10, 5  ;;  %v782_v19 = vshll.u32 %v4856_v63, 16 }
 0x190   : > { %v769_v20 = vor.u32 %v768_v13, %v765_v12  ;;  %v781_v24 = vrot.slane %v779_v14, 4  ;;  %v4859_v27 = vcombine.low %v6001_v22, %v713_v58  ;;  %v821_v29 = vcombine.high %v4842_v34, %v713_v58 }
 0x191   : > { %v777_v30 = vor.u32 %v776_v18, %v773_v17  ;;  %v784_v31 = vrot.slane %v782_v19, 5  ;;  %v4858_v39 = vcombine.low %v6009_v26, %v761_v16  ;;  %v789_v40 = vcombine.high %v4849_v46, %v761_v16 }
 0x192   : > { %v4860_v41 = vcombine.low %v6023_v33, %v769_v20  ;;  %v823_v42 = vcombine.high %v4850_v56, %v769_v20  ;;  %v830_v43 = vrot.slane %v4859_v27, %v5891_v15  ;;  %v837_v44 = vrot.slane %v821_v29, %v5891_v15 }
 0x193   : > { %v785_v45 = vor.u32 %v784_v31, %v781_v24  ;;  %v810_v48 = vrot.slane %v4858_v39, %v5891_v15  ;;  %v817_v49 = vrot.slane %v789_v40, %v5891_v15  ;;  %v4861_v22 = vcombine.low %v6021_v32, %v721_v11 }
 0x194   : > { %v844_v34 = vrot.slane %v4860_v41, %v5891_v15  ;;  %v851_v51 = vrot.slane %v823_v42, %v5891_v15  ;;  %v855_v26 = vcombine.high %v4843_v50, %v721_v11  ;;  %v4862_v46 = vcombine.low %v6013_v28, %v777_v30 }
 0x195   : > { %v818_v33 = vcombine.high %v6030_v36, %v810_v48  ;;  %v819_v52 = vcombine.low %v803_v37, %v817_v49  ;;  %v857_v53 = vcombine.high %v4851_v47, %v777_v30  ;;  %v864_v54 = vrot.slane %v4861_v22, %v5891_v15 }
 0x196   : > { %v852_v55 = vcombine.high %v830_v43, %v844_v34  ;;  %v853_v56 = vcombine.low %v837_v44, %v851_v51  ;;  %v871_v32 = vrot.slane %v855_v26, %v5891_v15  ;;  %v878_v58 = vrot.slane %v4862_v46, %v5891_v15 }
 0x197   : > { %v885_v59 = vrot.slane %v857_v53, %v5891_v15  ;;  %v4863_v50 = vcombine.low %v6003_v23, %v729_v62  ;;  %v889_v28 = vcombine.high %v4844_v35, %v729_v62  ;;  %v4864_v21 = vcombine.low %v6034_v38, %v785_v45 }
 0x198   : > { %v886_v36 = vcombine.high %v864_v54, %v878_v58  ;;  %v891_v37 = vcombine.high %v4852_v57, %v785_v45  ;;  %v935_v47 = vshrl.u32 %v819_v52, 16  ;;  %v930_v25 = vshrl.u32 %v818_v33, 16  ;;  %v5551_v54 = vld [vmem:[%s6989_s3 + $0x40] sm:$0xff]   ;;  %v5555_v58 = vld [vmem:[%s6989_s3 + $0x48] sm:$0xff]  }
 0x199   : > { %v887_v60 = vcombine.low %v871_v32, %v885_v59  ;;  %v898_v61 = vrot.slane %v4863_v50, %v5891_v15  ;;  %v912_v63 = vrot.slane %v4864_v21, %v5891_v15  ;;  %v905_v0 = vrot.slane %v889_v28, %v5891_v15  ;;  %v5554_v32 = vld [vmem:[%s6989_s3 + $0x80] sm:$0xff]   ;;  %5225 = vmatprep.subr.bf16.mxu1 %v5551_v54  ;;  %v5556_v59 = vld [vmem:[%s6989_s3 + $0xc8] sm:$0xff]   ;;  %v5559_v21 = vld [vmem:[%s6989_s3 + $0x50] sm:$0xff]  }
 0x19a   : > { %v919_v23 = vrot.slane %v891_v37, %v5891_v15  ;;  %v937_v35 = vrot.slane %v935_v47, 7  ;;  %v938_v57 = vshll.u32 %v819_v52, 16  ;;  %v943_v62 = vshrl.u32 %v852_v55, 16  ;;  %v345_v52 = vld [vmem:[#allocation3 + $0x4] sm:$0x7]  ;;  %v5552_v55 = vld [vmem:[%s6989_s3 + $0xc0] sm:$0xff]  }
 0x19b   : > { %v920_v38 = vcombine.high %v898_v61, %v912_v63  ;;  %v948_v1 = vshrl.u32 %v853_v56, 16  ;;  %v956_v4 = vshrl.u32 %v886_v36, 16  ;;  %v961_v5 = vshrl.u32 %v887_v60, 16  ;;  %5247 = vmatprep.subr.bf16.mxu0 %v5552_v55  ;;  %v5557_v50 = vld [vmem:[%s6989_s3 + $0x8] sm:$0xff]   ;;  %v5560_v36 = vld [vmem:[%s6989_s3 + $0xd0] sm:$0xff]   ;;  %v5564_v61 = vld [vmem:[%s6989_s3 + $0xd8] sm:$0xff]  }
 0x19c   : > { %v921_v3 = vcombine.low %v905_v0, %v919_v23  ;;  %v940_v6 = vor.u32 %v938_v57, %v937_v35  ;;  %v951_v8 = vshll.u32 %v853_v56, 16  ;;  %v964_v12 = vshll.u32 %v887_v60, 16  ;;  %v5553_v56 = vld [vmem:[%s6989_s3] sm:$0xff]   ;;  %v5558_v28 = vld [vmem:[%s6989_s3 + $0x88] sm:$0xff]   ;;  %v5561_v37 = vld [vmem:[%s6989_s3 + $0x10] sm:$0xff]  }
 0x19d   : > { %v950_v7 = vrot.slane %v948_v1, 7  ;;  %v969_v9 = vshrl.u32 %v920_v38, 16  ;;  %v963_v11 = vrot.slane %v961_v5, 7  ;;  %v4865_v14 = vrot.slane %v930_v25, 9  ;;  %v5562_v47 = vld [vmem:[%s6989_s3 + $0x90] sm:$0xff]   ;;  %v5563_v60 = vld [vmem:[%s6989_s3 + $0x58] sm:$0xff]  }
 0x19e   : > { %v974_v13 = vshrl.u32 %v921_v3, 16  ;;  %v4866_v16 = vrot.slane %v943_v62, 9  ;;  %v4867_v18 = vrot.slane %v956_v4, 9  ;;  %v977_v24 = vshll.u32 %v921_v3, 16  ;;  %v5565_v63 = vld [vmem:[%s6989_s3 + $0x18] sm:$0xff]   ;;  %v5567_v23 = vld [vmem:[%s6989_s3 + $0x60] sm:$0xff]  }
 0x19f   : > { %v953_v17 = vor.u32 %v951_v8, %v950_v7  ;;  %v966_v19 = vor.u32 %v964_v12, %v963_v11  ;;  %v941_v27 = vsel %vm6083_vm11, %v4865_v14, %v940_v6  ;;  %v4868_v30 = vrot.slane %v969_v9, 9  ;;  %v5566_v0 = vld [vmem:[%s6989_s3 + $0x98] sm:$0xff]   ;;  %v5568_v25 = vld [vmem:[%s6989_s3 + $0xe0] sm:$0xff]   ;;  %v350_v35 = vld [vmem:[#allocation3 + $0x2c] sm:$0x7] }
 0x1a0   : > { %v976_v20 = vrot.slane %v974_v13, 7  ;;  %v346_v53 = vsel %vm6099_vm14, 0, %v345_v52  ;;  %v5569_v38 = vld [vmem:[%s6989_s3 + $0x20] sm:$0xff]   ;;  %v351_v62 = vsel %vm6099_vm14, 0, %v350_v35  ;;  %v5571_v1 = vld [vmem:[%s6989_s3 + $0x68] sm:$0xff]   ;;  %v5575_v6 = vld [vmem:[%s6989_s3 + $0x70] sm:$0xff]  }
 0x1a1   : > { %v954_v29 = vsel %vm6083_vm11, %v4866_v16, %v953_v17  ;;  %v967_v31 = vsel %vm6083_vm11, %v4867_v18, %v966_v19  ;;  %347 = vst [vmem:[#allocation3 + $0x4] sm:$0x7] %v346_v53  ;;  %v5570_v57 = vld [vmem:[%s6989_s3 + $0xa0] sm:$0xff]   ;;  %v5572_v3 = vld [vmem:[%s6989_s3 + $0xe8] sm:$0xff]   ;;  %352 = vst [vmem:[#allocation3 + $0x2c] sm:$0x7] %v351_v62 }
 0x1a2   : > { %v979_v39 = vor.u32 %v977_v24, %v976_v20  ;;  %v1052_v40 = vcombine.low %v941_v27, %v954_v29  ;;  %v1053_v41 = vcombine.high %v941_v27, %v954_v29  ;;  %v5573_v4 = vld [vmem:[%s6989_s3 + $0x28] sm:$0xff]   ;;  %v5576_v7 = vld [vmem:[%s6989_s3 + $0xf0] sm:$0xff]   ;;  %v5579_v11 = vld [vmem:[%s6989_s3 + $0x78] sm:$0xff]  }
 0x1a3   : > { %v5574_v5 = vld [vmem:[%s6989_s3 + $0xa8] sm:$0xff]   ;;  %v5577_v8 = vld [vmem:[%s6989_s3 + $0x30] sm:$0xff]   ;;  %v5580_v12 = vld [vmem:[%s6989_s3 + $0xf8] sm:$0xff]  }
 0x1a4   : > { %v980_v42 = vsel %vm6083_vm11, %v4868_v30, %v979_v39  ;;  %v1062_v45 = vrot.slane %v1052_v40, %v5891_v15  ;;  %v1069_v48 = vrot.slane %v1053_v41, %v5891_v15  ;;  %v5578_v9 = vld [vmem:[%s6989_s3 + $0xb0] sm:$0xff]   ;;  %v5581_v13 = vld [vmem:[%s6989_s3 + $0x38] sm:$0xff]   ;;  %v5599_v16 = vld [vmem:[%s6989_s3 + $0x140] sm:$0xff]  }
 0x1a5   : > { %v1054_v43 = vcombine.low %v967_v31, %v980_v42  ;;  %v1055_v44 = vcombine.high %v967_v31, %v980_v42  ;;  %v5582_v14 = vld [vmem:[%s6989_s3 + $0xb8] sm:$0xff]   ;;  %v5600_v17 = vld [vmem:[%s6989_s3 + $0x1c0] sm:$0xff]   ;;  %v1414_v55 = vld [vmem:[#allocation3] sm:$0x8] }
 0x1a6   : > { %v4869_v31 = vld [vmem:[%s6992_s6] ss:$0 sm:$0xff]  ;;  %v1402_v35 = vld [vmem:[#allocation3 + $0xc] sm:$0x7] }
 0x1a7   : > { %v1076_v49 = vrot.slane %v1054_v43, %v5891_v15  ;;  %v1083_v22 = vrot.slane %v1055_v44, %v5891_v15 }
 0x1a8   : > { %v6209_v18 = vld [vmem:[#allocation3 + $0x4] sm:$0x3] }
 0x1a9   : > { %v1085_v34 = vcombine.high %v1062_v45, %v1076_v49  ;;  %v1087_v51 = vcombine.high %v1069_v48, %v1083_v22  ;;  %v1084_v26 = vcombine.low %v1062_v45, %v1076_v49  ;;  %v1086_v46 = vcombine.low %v1069_v48, %v1083_v22  ;;  %v6213_v30 = vld [vmem:[#allocation3 + $0x4] ss:$0 sps:$4 sm:$0x77]  }
 0x1aa   : > { %v4907_v19 = vcombine.low %v6209_v18, %v6209_v18  ;;  %v1519_v52 = vrot.slane %v6213_v30, 5 }
 0x1ab   : > { %1316 = vmatprep.mubr.bf16.mxu1 %v1085_v34  ;;  %1357 = vmatprep.mubr.bf16.mxu0 %v1087_v51 }
 0x1ac   : > { %1317 = vmatmul.mubr.bf16.vlgmr.msra.gmra.mrb[0].mxu1 %v1084_v26  ;;  %1358 = vmatmul.mubr.bf16.vlgmr.msra.gmra.mrb[4].mxu0 %v1086_v46  ;;  %v1476_v20 = vshrl.u32 %v4907_v19, 16  ;;  %v1479_v24 = vshll.u32 %v4907_v19, 16 }
 0x1ad   : > { %5226 = vmatpush3.bf16.msra.mxu1 %v5553_v56  ;;  %5248 = vmatpush3.bf16.msra.mxu0 %v5554_v32  ;;  %v6219_v56 = vld [vmem:[#allocation3 + $0x8] sm:$0x8]  ;;  %v1446_v32 = vld [vmem:[#allocation3 + $0x2c] sm:$0x3] }
 0x1ae   : > { %5227 = vmatprep.subr.bf16.mxu1 %v5555_v58  ;;  %5249 = vmatprep.subr.bf16.mxu0 %v5556_v59  ;;  %v1478_v41 = vrot.slane %v1476_v20, 4  ;;  %v1481_v42 = vrot.slane %v1479_v24, 5  ;;  %v4940_v59 = vcombine.low %v1519_v52, %v6219_v56 }
 0x1b0   : > { %v1482_v46 = vor.u32 %v1481_v42, %v1478_v41  ;;  %v1430_v41 = vld [vmem:[#allocation3 + $0x18] sm:$0x8]  ;;  %v6250_v42 = vld [vmem:[#allocation3 + $0x20] sm:$0x8] }
 0x1b1   : > { %5228 = vmatpush3.bf16.msra.mxu1 %v5557_v50  ;;  %5250 = vmatpush3.bf16.msra.mxu0 %v5558_v28  ;;  %v4934_v28 = vcombine.low %v1446_v32, %v1446_v32 }
 0x1b2   : > { %5229 = vmatprep.subr.bf16.mxu1 %v5559_v21  ;;  %5251 = vmatprep.subr.bf16.mxu0 %v5560_v36  ;;  %v4939_v58 = vcombine.low %v1414_v55, %v1482_v46 }
 0x1b5   : > { %5230 = vmatpush3.bf16.msra.mxu1 %v5561_v37  ;;  %5252 = vmatpush3.bf16.msra.mxu0 %v5562_v47  ;;  %v1677_v37 = vrot.slane %v4939_v58, %v5891_v15  ;;  %v1691_v47 = vrot.slane %v4940_v59, %v5891_v15 }
 0x1b6   : > { %5231 = vmatprep.subr.bf16.mxu1 %v5563_v60  ;;  %5253 = vmatprep.subr.bf16.mxu0 %v5564_v61 }
 0x1b7   : > { %v1699_v62 = vcombine.high %v1677_v37, %v1691_v47 }
 0x1b9   : > { %5232 = vmatpush3.bf16.msra.mxu1 %v5565_v63  ;;  %5254 = vmatpush3.bf16.msra.mxu0 %v5566_v0  ;;  %v1644_v63 = vshrl.u32 %v4934_v28, 16  ;;  %v1647_v0 = vshll.u32 %v4934_v28, 16  ;;  %v2004_v19 = vshrl.u32 %v1699_v62, 16 }
 0x1ba   : > { %5233 = vmatprep.subr.bf16.mxu1 %v5567_v23  ;;  %5255 = vmatprep.subr.bf16.mxu0 %v5568_v25 }
 0x1bd   : > { %5234 = vmatpush3.bf16.msra.mxu1 %v5569_v38  ;;  %5256 = vmatpush3.bf16.msra.mxu0 %v5570_v57  ;;  %v1408_v38 = vld [vmem:[#allocation3 + $0x1c] sm:$0x7]  ;;  %v4903_v57 = vcombine.low %v1414_v55, %v6209_v18 }
 0x1be   : > { %5235 = vmatprep.subr.bf16.mxu1 %v5571_v1  ;;  %5257 = vmatprep.subr.bf16.mxu0 %v5572_v3 }
 0x1bf   : > { %v1668_v20 = vcombine.high %v4903_v57, %v1482_v46 }
 0x1c1   : > { %5236 = vmatpush3.bf16.msra.mxu1 %v5573_v4  ;;  %5258 = vmatpush3.bf16.msra.mxu0 %v5574_v5 }
 0x1c2   : > { %5237 = vmatprep.subr.bf16.mxu1 %v5575_v6  ;;  %5259 = vmatprep.subr.bf16.mxu0 %v5576_v7  ;;  %v1405_v6 = vld [vmem:[#allocation3 + $0x14] sm:$0x7]  ;;  %v1411_v7 = vld [vmem:[#allocation3 + $0x24] sm:$0x7] }
 0x1c5   : > { %5238 = vmatpush3.bf16.msra.mxu1 %v5577_v8  ;;  %5260 = vmatpush3.bf16.msra.mxu0 %v5578_v9 }
 0x1c6   : > { %5239 = vmatprep.subr.bf16.mxu1 %v5579_v11  ;;  %5261 = vmatprep.subr.bf16.mxu0 %v5580_v12  ;;  %v1646_v11 = vrot.slane %v1644_v63, 4  ;;  %v1649_v12 = vrot.slane %v1647_v0, 5 }
 0x1c9   : > { %5240 = vmatpush3.bf16.msra.mxu1 %v5581_v13  ;;  %5262 = vmatpush3.bf16.msra.mxu0 %v5582_v14 }
 0x1ca   : > { %5269 = vmatprep.subr.bf16.mxu1 %v5599_v16  ;;  %5291 = vmatprep.subr.bf16.mxu0 %v5600_v17  ;;  %v6237_v16 = vld [vmem:[#allocation3 + $0x28] sm:$0x8] }
 0x1cb   : > { %v4930_v24 = vcombine.low %v6237_v16, %v1446_v32 }
 0x27f   : > { %v5197_v27 = vpop.f32.mrb[0].mxu1  ;;  %v5219_v29 = vpop.f32.mrb[4].mxu0 }
 0x280   : > { %v5198_v39 = vpop.f32.mrb[1].mxu1  ;;  %v5220_v40 = vpop.f32.mrb[5].mxu0 }
 0x281   : > { %v5199_v43 = vadd.f32 %v5198_v39, %v5197_v27  ;;  %v5221_v44 = vadd.f32 %v5220_v40, %v5219_v29  ;;  %v5200_v45 = vpop.f32.mrb[2].mxu1  ;;  %v5222_v48 = vpop.f32.mrb[6].mxu0  ;;  %v6244_v27 = vor.u32 %v1649_v12, %v1646_v11  ;;  %v1416_v29 = vld [vmem:[#allocation3 + $0x8] sm:$0x8]  ;;  %v6248_v39 = vld [vmem:[#allocation3 + $0x18] sm:$0x8] }
 0x282   : > { %v5201_v49 = vpop.f32.mrb[3].mxu1  ;;  %v5223_v22 = vpop.f32.mrb[7].mxu0  ;;  %v1428_v40 = vld [vmem:[#allocation3 + $0x10] sm:$0x8] }
 0x283   : > { %v1319_v34 = vadd.f32 %v5199_v43, %v4869_v31  ;;  %v5202_v51 = vadd.f32 %v5201_v49, %v5200_v45  ;;  %v5224_v26 = vadd.f32 %v5223_v22, %v5222_v48  ;;  %v6252_v43 = vrot.slane %v2004_v19, 9 }
 0x284   : > { %v1684_v48 = vrot.slane %v1668_v20, %v5891_v15  ;;  %v4950_v49 = vcombine.low %v6237_v16, %v6244_v27  ;;  %v6260_v22 = vcombine.high %v4930_v24, %v6244_v27  ;;  %v6332_v27 = vld [vmem:[#allocation3 + $0x20] sm:$0x8] }
 0x285   : > { %v1360_v53 = vadd.f32 %v5221_v44, %v1319_v34  ;;  %v1322_v54 = vadd.f32 %v5202_v51, %v4869_v31  ;;  %v6246_v31 = vld [vmem:[#allocation3 + $0x10] sm:$0x8] }
 0x287   : > { %v1363_v50 = vadd.f32 %v5224_v26, %v1322_v54  ;;  %v1366_v21 = vmax.f32 %v1360_v53, 0.0 }
 0x289   : > { %v1367_v36 = vmax.f32 %v1363_v50, 0.0 }
 0x28b   : > { %v1368_v60 = vpack.c.bf16 %v1367_v36, %v1366_v21  ;;  %v4902_v61 = vpack.c.bf16 %v1367_v36, %v1367_v36 }
 0x28d   : > { %v1377_v23 = vrot.slane %v1368_v60, %v5891_v15  ;;  %v1384_v25 = vrot.slane %v4902_v61, %v5891_v15 }
 0x28f   : > { %v1385_v1 = vcombine.high %v1377_v23, %v1377_v23  ;;  %v1386_v3 = vcombine.high %v1384_v25, %v1384_v25  ;;  %v1390_v4 = vsel %vm1387_vm15, %v1377_v23, 0  ;;  %v1396_v5 = vsel %vm1387_vm15, %v1384_v25, 0 }
 0x290   : > { %v1403_v8 = vsel %vm6099_vm14, %v1390_v4, %v1402_v35  ;;  %v1409_v9 = vsel %vm6099_vm14, %v1396_v5, %v1408_v38 }
 0x291   : > { %v1393_v13 = vsel %vm1387_vm15, %v1385_v1, 0  ;;  %v1399_v14 = vsel %vm1387_vm15, %v1386_v3, 0  ;;  %1404 = vst [vmem:[#allocation3 + $0xc] sm:$0x7] %v1403_v8  ;;  %1410 = vst [vmem:[#allocation3 + $0x1c] sm:$0x7] %v1409_v9 }
 0x292   : > { %v1406_v17 = vsel %vm6099_vm14, %v1393_v13, %v1405_v6  ;;  %v1412_v18 = vsel %vm6099_vm14, %v1399_v14, %v1411_v7 }
 0x293   : > { %1407 = vst [vmem:[#allocation3 + $0x14] sm:$0x7] %v1406_v17  ;;  %1413 = vst [vmem:[#allocation3 + $0x24] sm:$0x7] %v1412_v18 }
 0x298   : > { %v1417_v44 = vld [vmem:[#allocation3 + $0xc] sm:$0x3]  ;;  %v6254_v45 = vld [vmem:[#allocation3 + $0x1c] sm:$0x3] }
 0x299   : > { %v1427_v34 = vld [vmem:[#allocation3 + $0xc] sm:$0x3]  ;;  %v1431_v51 = vld [vmem:[#allocation3 + $0x1c] sm:$0x3]  ;;  %v4904_v26 = vcombine.low %v1416_v29, %v1417_v44  ;;  %v4906_v46 = vcombine.low %v6248_v39, %v6254_v45  ;;  %v4908_v53 = vcombine.low %v1417_v44, %v1417_v44  ;;  %v4910_v54 = vcombine.low %v6254_v45, %v6254_v45 }
 0x29a   : > { %v1419_v55 = vld [vmem:[#allocation3 + $0x14] sm:$0x3]  ;;  %v4915_v58 = vcombine.low %v6219_v56, %v1427_v34  ;;  %v4917_v59 = vcombine.low %v1430_v41, %v1431_v51  ;;  %v6267_v50 = vcombine.low %v1427_v34, %v1427_v34  ;;  %v6269_v28 = vcombine.low %v1431_v51, %v1431_v51  ;;  %v6271_v21 = vld [vmem:[#allocation3 + $0x24] sm:$0x3]  ;;  %v6330_v16 = vld [vmem:[#allocation3 + $0x1c] sm:$0x3] }
 0x29b   : > { %v1429_v32 = vld [vmem:[#allocation3 + $0x14] sm:$0x3]  ;;  %v4905_v36 = vcombine.low %v6246_v31, %v1419_v55  ;;  %v4909_v37 = vcombine.low %v1419_v55, %v1419_v55  ;;  %v1484_v47 = vshrl.u32 %v4908_v53, 16  ;;  %v1487_v60 = vshll.u32 %v4908_v53, 16 }
 0x29c   : > { %v1500_v61 = vshrl.u32 %v4910_v54, 16  ;;  %v1503_v63 = vshll.u32 %v4910_v54, 16  ;;  %v5592_v0 = vld [vmem:[#allocation3 + $0xc] ss:$0 sps:$4 sm:$0x77]   ;;  %v4916_v23 = vcombine.low %v1428_v40, %v1429_v32  ;;  %v4918_v25 = vcombine.low %v6250_v42, %v6271_v21 }
 0x29d   : > { %v1486_v56 = vrot.slane %v1484_v47, 4  ;;  %v1489_v35 = vrot.slane %v1487_v60, 5  ;;  %v1492_v38 = vshrl.u32 %v4909_v37, 16  ;;  %v1495_v57 = vshll.u32 %v4909_v37, 16 }
 0x29e   : > { %v1502_v62 = vrot.slane %v1500_v61, 4  ;;  %v1505_v1 = vrot.slane %v1503_v63, 5  ;;  %v5593_v3 = vld [vmem:[#allocation3 + $0x14] ss:$0 sps:$4 sm:$0x77]   ;;  %v1520_v4 = vrot.slane %v5592_v0, 5  ;;  %v1670_v5 = vcombine.high %v1519_v52, %v4915_v58 }
 0x29f   : > { %v1490_v6 = vor.u32 %v1489_v35, %v1486_v56  ;;  %v1494_v7 = vrot.slane %v1492_v38, 4  ;;  %v1497_v8 = vrot.slane %v1495_v57, 5  ;;  %v5594_v9 = vld [vmem:[#allocation3 + $0x1c] ss:$0 sps:$4 sm:$0x77]   ;;  %v6278_v11 = vcombine.low %v1429_v32, %v1429_v32 }
 0x2a0   : > { %v1506_v12 = vor.u32 %v1505_v1, %v1502_v62  ;;  %v1521_v13 = vrot.slane %v5593_v3, 5  ;;  %v1698_v14 = vrot.slane %v1670_v5, %v5891_v15  ;;  %v4943_v17 = vcombine.low %v1520_v4, %v1428_v40 }
 0x2a1   : > { %v1498_v18 = vor.u32 %v1497_v8, %v1494_v7  ;;  %v1522_v19 = vrot.slane %v5594_v9, 5  ;;  %v4942_v20 = vcombine.low %v1416_v29, %v1490_v6  ;;  %v1752_v24 = vcombine.high %v4904_v26, %v1490_v6 }
 0x2a2   : > { %v1700_v44 = vcombine.low %v1684_v48, %v1698_v14  ;;  %v1754_v45 = vcombine.high %v1520_v4, %v4916_v23  ;;  %v1775_v30 = vrot.slane %v4943_v17, %v5891_v15  ;;  %v4946_v52 = vcombine.low %v1521_v13, %v1430_v41 }
 0x2a3   : > { %v1761_v34 = vrot.slane %v4942_v20, %v5891_v15  ;;  %v1768_v51 = vrot.slane %v1752_v24, %v5891_v15  ;;  %v4945_v53 = vcombine.low %v6246_v31, %v1498_v18  ;;  %v1836_v54 = vcombine.high %v4905_v36, %v1498_v18 }
 0x2a4   : > { %v1782_v55 = vrot.slane %v1754_v45, %v5891_v15  ;;  %v1838_v32 = vcombine.high %v1521_v13, %v4917_v59  ;;  %v1859_v40 = vrot.slane %v4946_v52, %v5891_v15  ;;  %v4948_v29 = vcombine.low %v6248_v39, %v1506_v12 }
 0x2a5   : > { %v1783_v26 = vcombine.high %v1761_v34, %v1775_v30  ;;  %v1845_v48 = vrot.slane %v4945_v53, %v5891_v15  ;;  %v1852_v58 = vrot.slane %v1836_v54, %v5891_v15  ;;  %v1920_v41 = vcombine.high %v4906_v46, %v1506_v12 }
 0x2a6   : > { %v1784_v37 = vcombine.low %v1768_v51, %v1782_v55  ;;  %v1866_v47 = vrot.slane %v1838_v32, %v5891_v15  ;;  %v4949_v60 = vcombine.low %v1522_v19, %v6250_v42  ;;  %v1922_v31 = vcombine.high %v1522_v19, %v4918_v25 }
 0x2a7   : > { %v1867_v36 = vcombine.high %v1845_v48, %v1859_v40  ;;  %v1929_v61 = vrot.slane %v4948_v29, %v5891_v15  ;;  %v1936_v59 = vrot.slane %v1920_v41, %v5891_v15  ;;  %v2009_v63 = vshrl.u32 %v1700_v44, 16 }
 0x2a8   : > { %v1868_v0 = vcombine.low %v1852_v58, %v1866_v47  ;;  %v1943_v39 = vrot.slane %v4949_v60, %v5891_v15  ;;  %v1950_v23 = vrot.slane %v1922_v31, %v5891_v15  ;;  %v2012_v56 = vshll.u32 %v1700_v44, 16  ;;  %v6322_v60 = vld [vmem:[#allocation3 + $0x10] sm:$0x8]  ;;  %v6324_v31 = vld [vmem:[#allocation3 + $0x14] sm:$0x3] }
 0x2a9   : > { %v2011_v35 = vrot.slane %v2009_v63, 7  ;;  %v2043_v46 = vshrl.u32 %v1783_v26, 16  ;;  %v2048_v38 = vshrl.u32 %v1784_v37, 16  ;;  %v2051_v57 = vshll.u32 %v1784_v37, 16 }
 0x2aa   : > { %v1951_v62 = vcombine.high %v1929_v61, %v1943_v39  ;;  %v1952_v1 = vcombine.low %v1936_v59, %v1950_v23  ;;  %v2082_v42 = vshrl.u32 %v1867_v36, 16  ;;  %v2087_v25 = vshrl.u32 %v1868_v0, 16  ;;  %v6326_v36 = vld [vmem:[#allocation3 + $0x14] ss:$0 sps:$4 sm:$0x77]  }
 0x2ab   : > { %v2014_v3 = vor.u32 %v2012_v56, %v2011_v35  ;;  %v4954_v4 = vrot.slane %v2043_v46, 9  ;;  %v2050_v5 = vrot.slane %v2048_v38, 7  ;;  %v2090_v6 = vshll.u32 %v1868_v0, 16  ;;  %v6328_v61 = vld [vmem:[#allocation3 + $0x18] sm:$0x8] }
 0x2ac   : > { %v4957_v7 = vrot.slane %v2082_v42, 9  ;;  %v2089_v8 = vrot.slane %v2087_v25, 7  ;;  %v2121_v9 = vshrl.u32 %v1951_v62, 16  ;;  %v2126_v12 = vshrl.u32 %v1952_v1, 16 }
 0x2ad   : > { %v2015_v13 = vsel %vm6083_vm11, %v6252_v43, %v2014_v3  ;;  %v2053_v14 = vor.u32 %v2051_v57, %v2050_v5  ;;  %v2129_v17 = vshll.u32 %v1952_v1, 16  ;;  %v4922_v18 = vcombine.low %v6271_v21, %v6271_v21  ;;  %v6337_v46 = vld [vmem:[#allocation3 + $0x1c] ss:$0 sps:$4 sm:$0x77]   ;;  %v6341_v57 = vld [vmem:[#allocation3 + $0x24] sm:$0x3] }
 0x2ae   : > { %v2092_v19 = vor.u32 %v2090_v6, %v2089_v8  ;;  %v4960_v20 = vrot.slane %v2121_v9, 9  ;;  %v2128_v24 = vrot.slane %v2126_v12, 7  ;;  %v1548_v44 = vshrl.u32 %v6267_v50, 16  ;;  %v6339_v38 = vld [vmem:[#allocation3 + $0x24] ss:$0 sps:$4 sm:$0x77]  }
 0x2af   : > { %v2054_v45 = vsel %vm6083_vm11, %v4954_v4, %v2053_v14  ;;  %v1551_v30 = vshll.u32 %v6267_v50, 16  ;;  %v1556_v52 = vshrl.u32 %v6278_v11, 16  ;;  %v1559_v34 = vshll.u32 %v6278_v11, 16  ;;  %v5607_v50 = vld [vmem:[#allocation3 + $0xc] ss:$0 sps:$4 sm:$0x77]  }
 0x2b0   : > { %v2093_v43 = vsel %vm6083_vm11, %v4957_v7, %v2092_v19  ;;  %v2131_v51 = vor.u32 %v2129_v17, %v2128_v24  ;;  %v2310_v53 = vcombine.low %v2015_v13, %v2054_v45  ;;  %v2311_v21 = vcombine.high %v2015_v13, %v2054_v45  ;;  %v5601_v6 = vld [vmem:[%s6989_s3 + $0x100] sm:$0xff]   ;;  %v5619_v14 = vld [vmem:[%s6989_s3 + $0x148] sm:$0xff]  }
 0x2b1   : > { %v1550_v54 = vrot.slane %v1548_v44, 4  ;;  %v1553_v55 = vrot.slane %v1551_v30, 5  ;;  %v1558_v32 = vrot.slane %v1556_v52, 4  ;;  %v1561_v40 = vrot.slane %v1559_v34, 5  ;;  %v5602_v7 = vld [vmem:[%s6989_s3 + $0x180] sm:$0xff]   ;;  %v5620_v17 = vld [vmem:[%s6989_s3 + $0x1c8] sm:$0xff]  }
 0x2b2   : > { %v2132_v29 = vsel %vm6083_vm11, %v4960_v20, %v2131_v51  ;;  %v1564_v26 = vshrl.u32 %v6269_v28, 16  ;;  %v6316_v11 = vrot.slane %v4950_v49, %v5891_v15  ;;  %v1984_v48 = vrot.slane %v6260_v22, %v5891_v15  ;;  %v5635_v22 = vld [vmem:[%s6989_s3 + $0x168] sm:$0xff]  }
 0x2b3   : > { %v2312_v58 = vcombine.low %v2093_v43, %v2132_v29  ;;  %v2320_v41 = vrot.slane %v2310_v53, %v5891_v15  ;;  %v2313_v37 = vcombine.high %v2093_v43, %v2132_v29  ;;  %v2327_v47 = vrot.slane %v2311_v21, %v5891_v15  ;;  %v5621_v21 = vld [vmem:[%s6989_s3 + $0x108] sm:$0xff]  }
 0x2b4   : > { %v1566_v49 = vrot.slane %v1564_v26, 4  ;;  %v1567_v59 = vshll.u32 %v6269_v28, 16  ;;  %v1572_v63 = vshrl.u32 %v4922_v18, 16  ;;  %v1575_v0 = vshll.u32 %v4922_v18, 16  ;;  %v5622_v29 = vld [vmem:[%s6989_s3 + $0x188] sm:$0xff]  }
 0x2b5   : > { %v2334_v39 = vrot.slane %v2312_v58, %v5891_v15  ;;  %v2341_v23 = vrot.slane %v2313_v37, %v5891_v15  ;;  %v1554_v56 = vor.u32 %v1553_v55, %v1550_v54  ;;  %v1562_v35 = vor.u32 %v1561_v40, %v1558_v32  ;;  %v5623_v37 = vld [vmem:[%s6989_s3 + $0x150] sm:$0xff]  }
 0x2b6   : > { %v1569_v62 = vrot.slane %v1567_v59, 5  ;;  %v1574_v1 = vrot.slane %v1572_v63, 4  ;;  %v1577_v42 = vrot.slane %v1575_v0, 5  ;;  %v1591_v25 = vrot.slane %v5607_v50, 5 }
 0x2b7   : > { %v2343_v3 = vcombine.high %v2320_v41, %v2334_v39  ;;  %v2345_v28 = vcombine.high %v2327_v47, %v2341_v23  ;;  %v2342_v4 = vcombine.low %v2320_v41, %v2334_v39  ;;  %v2344_v5 = vcombine.low %v2327_v47, %v2341_v23  ;;  %v5625_v23 = vld [vmem:[%s6989_s3 + $0x110] sm:$0xff]  }
 0x2b8   : > { %v1570_v8 = vor.u32 %v1569_v62, %v1566_v49  ;;  %v6349_v9 = vor.u32 %v1577_v42, %v1574_v1  ;;  %v1592_v12 = vrot.slane %v6326_v36, 5  ;;  %v4927_v13 = vcombine.low %v6322_v60, %v6324_v31  ;;  %v5624_v49 = vld [vmem:[%s6989_s3 + $0x1d0] sm:$0xff]  }
 0x2b9   : > { %2872 = vmatprep.mubr.bf16.mxu1 %v2343_v3  ;;  %2913 = vmatprep.mubr.bf16.mxu0 %v2345_v28  ;;  %v1593_v18 = vrot.slane %v6337_v46, 5  ;;  %v4928_v19 = vcombine.low %v6328_v61, %v6330_v16  ;;  %v4929_v20 = vcombine.low %v6332_v27, %v6341_v57  ;;  %v4931_v24 = vcombine.low %v6324_v31, %v6324_v31  ;;  %v5626_v62 = vld [vmem:[%s6989_s3 + $0x190] sm:$0xff]   ;;  %v5627_v3 = vld [vmem:[%s6989_s3 + $0x158] sm:$0xff]  }
 0x2ba   : > { %2873 = vmatmul.mubr.bf16.vlgmr.msra.gmra.mrb[4].mxu1 %v2342_v4  ;;  %2914 = vmatmul.mubr.bf16.vlgmr.msra.gmra.mrb[8].mxu0 %v2344_v5  ;;  %v1594_v44 = vrot.slane %v6339_v38, 5  ;;  %v4932_v45 = vcombine.low %v6330_v16, %v6330_v16  ;;  %v4933_v30 = vcombine.low %v6341_v57, %v6341_v57  ;;  %v6372_v52 = vcombine.low %v1554_v56, %v1591_v25 }
 0x2bb   : > { %5270 = vmatpush3.bf16.msra.mxu1 %v5601_v6  ;;  %5292 = vmatpush3.bf16.msra.mxu0 %v5602_v7  ;;  %v1620_v34 = vshrl.u32 %v4931_v24, 16  ;;  %v1623_v43 = vshll.u32 %v4931_v24, 16  ;;  %v1702_v51 = vcombine.high %v1554_v56, %v1591_v25  ;;  %v6374_v53 = vcombine.low %v1562_v35, %v1592_v12 }
 0x2bc   : > { %v1628_v54 = vshrl.u32 %v4932_v45, 16  ;;  %v1631_v55 = vshll.u32 %v4932_v45, 16  ;;  %v1636_v32 = vshrl.u32 %v4933_v30, 16  ;;  %v1639_v40 = vshll.u32 %v4933_v30, 16  ;;  %5271 = vmatprep.subr.bf16.mxu1 %v5619_v14  ;;  %5293 = vmatprep.subr.bf16.mxu0 %v5620_v17  ;;  %v5632_v30 = vld [vmem:[%s6989_s3 + $0x1e0] sm:$0xff]  }
 0x2bd   : > { %v1622_v26 = vrot.slane %v1620_v34, 4  ;;  %v1625_v50 = vrot.slane %v1623_v43, 5  ;;  %v1711_v58 = vrot.slane %v6372_v52, %v5891_v15  ;;  %v1718_v41 = vrot.slane %v1702_v51, %v5891_v15 }
 0x2be   : > { %v1630_v47 = vrot.slane %v1628_v54, 4  ;;  %v1633_v31 = vrot.slane %v1631_v55, 5  ;;  %v1638_v36 = vrot.slane %v1636_v32, 4  ;;  %v1641_v16 = vrot.slane %v1639_v40, 5  ;;  %v5633_v32 = vld [vmem:[%s6989_s3 + $0x120] sm:$0xff]  }
 0x2bf   : > { %v1626_v59 = vor.u32 %v1625_v50, %v1622_v26  ;;  %v1786_v63 = vcombine.high %v1562_v35, %v1592_v12  ;;  %v1795_v0 = vrot.slane %v6374_v53, %v5891_v15  ;;  %v1869_v39 = vcombine.low %v1570_v8, %v1593_v18  ;;  %5272 = vmatpush3.bf16.msra.mxu1 %v5621_v21  ;;  %v5634_v26 = vld [vmem:[%s6989_s3 + $0x1a0] sm:$0xff]  }
 0x2c0   : > { %v1634_v56 = vor.u32 %v1633_v31, %v1630_v47  ;;  %v1642_v46 = vor.u32 %v1641_v16, %v1638_v36  ;;  %v1870_v38 = vcombine.high %v1570_v8, %v1593_v18  ;;  %v1953_v57 = vcombine.low %v6349_v9, %v1594_v44  ;;  %5294 = vmatpush3.bf16.msra.mxu0 %v5622_v29 }
 0x2c1   : > { %v4941_v35 = vcombine.low %v6322_v60, %v1626_v59  ;;  %v1704_v1 = vcombine.high %v4927_v13, %v1626_v59  ;;  %v1802_v42 = vrot.slane %v1786_v63, %v5891_v15  ;;  %v1879_v25 = vrot.slane %v1869_v39, %v5891_v15  ;;  %5273 = vmatprep.subr.bf16.mxu1 %v5623_v37  ;;  %v5628_v60 = vld [vmem:[%s6989_s3 + $0x1d8] sm:$0xff]  }
 0x2c2   : > { %v4944_v28 = vcombine.low %v6328_v61, %v1634_v56  ;;  %v1788_v4 = vcombine.high %v4928_v19, %v1634_v56  ;;  %v4947_v5 = vcombine.low %v6332_v27, %v1642_v46  ;;  %v1872_v6 = vcombine.high %v4929_v20, %v1642_v46  ;;  %5295 = vmatprep.subr.bf16.mxu0 %v5624_v49  ;;  %v5629_v61 = vld [vmem:[%s6989_s3 + $0x118] sm:$0xff]   ;;  %v5638_v46 = vld [vmem:[%s6989_s3 + $0x1a8] sm:$0xff]  }
 0x2c3   : > { %v1725_v7 = vrot.slane %v4941_v35, %v5891_v15  ;;  %v1732_v8 = vrot.slane %v1704_v1, %v5891_v15  ;;  %v1886_v12 = vrot.slane %v1870_v38, %v5891_v15  ;;  %v1954_v13 = vcombine.high %v6349_v9, %v1594_v44  ;;  %5274 = vmatpush3.bf16.msra.mxu1 %v5625_v23  ;;  %v5630_v19 = vld [vmem:[%s6989_s3 + $0x198] sm:$0xff]   ;;  %v5631_v9 = vld [vmem:[%s6989_s3 + $0x160] sm:$0xff]   ;;  %v5639_v38 = vld [vmem:[%s6989_s3 + $0x170] sm:$0xff]  }
 0x2c4   : > { %v1809_v27 = vrot.slane %v4944_v28, %v5891_v15  ;;  %v1816_v14 = vrot.slane %v1788_v4, %v5891_v15  ;;  %v1893_v17 = vrot.slane %v4947_v5, %v5891_v15  ;;  %v1900_v18 = vrot.slane %v1872_v6, %v5891_v15  ;;  %5296 = vmatpush3.bf16.msra.mxu0 %v5626_v62 }
 0x2c5   : > { %v1733_v20 = vcombine.high %v1711_v58, %v1725_v7  ;;  %v1734_v24 = vcombine.low %v1718_v41, %v1732_v8  ;;  %v1963_v44 = vrot.slane %v1953_v57, %v5891_v15  ;;  %v1970_v45 = vrot.slane %v1954_v13, %v5891_v15  ;;  %5275 = vmatprep.subr.bf16.mxu1 %v5627_v3  ;;  %v5636_v41 = vld [vmem:[%s6989_s3 + $0x1e8] sm:$0xff]   ;;  %v5658_v7 = vld [vmem:[#allocation3 + $0x2c] ss:$0 sps:$4 sm:$0x77]   ;;  %v5644_v13 = vld [vmem:[%s6989_s3 + $0x1f8] sm:$0xff]  }
 0x2c6   : > { %v1817_v52 = vcombine.high %v1795_v0, %v1809_v27  ;;  %v1818_v34 = vcombine.low %v1802_v42, %v1816_v14  ;;  %v1901_v43 = vcombine.high %v1879_v25, %v1893_v17  ;;  %v1902_v51 = vcombine.low %v1886_v12, %v1900_v18  ;;  %5297 = vmatprep.subr.bf16.mxu0 %v5628_v60  ;;  %v5637_v0 = vld [vmem:[%s6989_s3 + $0x128] sm:$0xff]   ;;  %v5640_v42 = vld [vmem:[%s6989_s3 + $0x1f0] sm:$0xff]   ;;  %v5643_v12 = vld [vmem:[%s6989_s3 + $0x178] sm:$0xff]  }
 0x2c7   : > { %v1985_v53 = vcombine.high %v1963_v44, %v6316_v11  ;;  %v1986_v21 = vcombine.low %v1970_v45, %v1984_v48  ;;  %v2017_v54 = vshrl.u32 %v1733_v20, 16  ;;  %v2022_v55 = vshrl.u32 %v1734_v24, 16  ;;  %5276 = vmatpush3.bf16.msra.mxu1 %v5629_v61  ;;  %v5641_v60 = vld [vmem:[%s6989_s3 + $0x130] sm:$0xff]   ;;  %v5655_v27 = vld [vmem:[#allocation3 + $0x14] ss:$0 sps:$4 sm:$0x77]  }
 0x2c8   : > { %v2056_v40 = vshrl.u32 %v1817_v52, 16  ;;  %v2061_v29 = vshrl.u32 %v1818_v34, 16  ;;  %5298 = vmatpush3.bf16.msra.mxu0 %v5630_v19  ;;  %5277 = vmatprep.subr.bf16.mxu1 %v5631_v9  ;;  %v2025_v48 = vshll.u32 %v1734_v24, 16  ;;  %v2095_v50 = vshrl.u32 %v1901_v43, 16  ;;  %v5642_v8 = vld [vmem:[%s6989_s3 + $0x1b0] sm:$0xff]   ;;  %v5645_v20 = vld [vmem:[%s6989_s3 + $0x138] sm:$0xff]  }
 0x2c9   : > { %v2024_v11 = vrot.slane %v2022_v55, 7  ;;  %v2100_v58 = vshrl.u32 %v1902_v51, 16  ;;  %5299 = vmatprep.subr.bf16.mxu0 %v5632_v30  ;;  %v4952_v37 = vrot.slane %v2017_v54, 9  ;;  %v2064_v31 = vshll.u32 %v1818_v34, 16  ;;  %v5646_v52 = vld [vmem:[%s6989_s3 + $0x1b8] sm:$0xff]  }
 0x2ca   : > { %v2063_v47 = vrot.slane %v2061_v29, 7  ;;  %v2134_v36 = vshrl.u32 %v1985_v53, 16  ;;  %v2103_v59 = vshll.u32 %v1902_v51, 16  ;;  %v2139_v63 = vshrl.u32 %v1986_v21, 16 }
 0x2cb   : > { %v2027_v16 = vor.u32 %v2025_v48, %v2024_v11  ;;  %v2102_v49 = vrot.slane %v2100_v58, 7  ;;  %5278 = vmatpush3.bf16.msra.mxu1 %v5633_v32  ;;  %v4955_v39 = vrot.slane %v2056_v40, 9  ;;  %v4958_v56 = vrot.slane %v2095_v50, 9  ;;  %v5657_v14 = vld [vmem:[#allocation3 + $0x24] ss:$0 sps:$4 sm:$0x77]  }
 0x2cc   : > { %v2066_v23 = vor.u32 %v2064_v31, %v2063_v47  ;;  %5300 = vmatpush3.bf16.msra.mxu0 %v5634_v26  ;;  %5279 = vmatprep.subr.bf16.mxu1 %v5635_v22  ;;  %v2141_v35 = vrot.slane %v2139_v63, 7  ;;  %v2142_v1 = vshll.u32 %v1986_v21, 16  ;;  %v4961_v3 = vrot.slane %v2134_v36, 9  ;;  %v5656_v24 = vld [vmem:[#allocation3 + $0x1c] ss:$0 sps:$4 sm:$0x77]  }
 0x2cd   : > { %v2028_v57 = vsel %vm6083_vm11, %v4952_v37, %v2027_v16  ;;  %v2105_v62 = vor.u32 %v2103_v59, %v2102_v49  ;;  %5301 = vmatprep.subr.bf16.mxu0 %v5636_v41  ;;  %v1666_v30 = vrot.slane %v5658_v7, 5  ;;  %v1663_v34 = vrot.slane %v5655_v27, 5  ;;  %v5647_v21 = vld [vmem:[%s6989_s3 + $0x200] sm:$0xff]   ;;  %v5648_v22 = vld [vmem:[%s6989_s3 + $0x208] sm:$0xff]   ;;  %v5649_v47 = vld [vmem:[%s6989_s3 + $0x210] sm:$0xff]  }
 0x2ce   : > { %v2067_v25 = vsel %vm6083_vm11, %v4955_v39, %v2066_v23  ;;  %v2144_v4 = vor.u32 %v2142_v1, %v2141_v35  ;;  %v1665_v43 = vrot.slane %v5657_v14, 5  ;;  %v1664_v54 = vrot.slane %v5656_v24, 5  ;;  %v5650_v23 = vld [vmem:[%s6989_s3 + $0x218] sm:$0xff]   ;;  %v5652_v27 = vld [vmem:[%s6989_s3 + $0x228] sm:$0xff]  }
 0x2cf   : > { %v2106_v28 = vsel %vm6083_vm11, %v4958_v56, %v2105_v62  ;;  %v2346_v5 = vcombine.low %v2028_v57, %v2067_v25  ;;  %v2347_v6 = vcombine.high %v2028_v57, %v2067_v25  ;;  %5280 = vmatpush3.bf16.msra.mxu1 %v5637_v0  ;;  %v1987_v32 = vcombine.high %v1666_v30, %v1666_v30 }
 0x2d0   : > { %5302 = vmatpush3.bf16.msra.mxu0 %v5638_v46  ;;  %5281 = vmatprep.subr.bf16.mxu1 %v5639_v38  ;;  %v2145_v61 = vsel %vm6083_vm11, %v4961_v3, %v2144_v4  ;;  %v1735_v40 = vcombine.high %v1663_v34, %v1663_v34  ;;  %v1903_v29 = vcombine.high %v1665_v43, %v1665_v43  ;;  %v5651_v3 = vld [vmem:[%s6989_s3 + $0x220] sm:$0xff]  }
 0x2d1   : > { %5303 = vmatprep.subr.bf16.mxu0 %v5640_v42  ;;  %v2348_v17 = vcombine.low %v2106_v28, %v2145_v61  ;;  %v2356_v18 = vrot.slane %v2346_v5, %v5891_v15  ;;  %v2349_v19 = vcombine.high %v2106_v28, %v2145_v61  ;;  %v2363_v9 = vrot.slane %v2347_v6, %v5891_v15 }
 0x2d2   : > { %v1819_v11 = vcombine.high %v1664_v54, %v1664_v54  ;;  %v1994_v48 = vrot.slane %v1666_v30, %v5891_v15  ;;  %v2001_v50 = vrot.slane %v1987_v32, %v5891_v15  ;;  %v1749_v58 = vrot.slane %v1735_v40, %v5891_v15  ;;  %v5662_v32 = vld [vmem:[%s6990_s4 + $0x80] sm:$0xff]   ;;  %v5663_v40 = vld [vmem:[%s6990_s4 + $0x48] sm:$0xff]  }
 0x2d3   : > { %5282 = vmatpush3.bf16.msra.mxu1 %v5641_v60  ;;  %v2370_v44 = vrot.slane %v2348_v17, %v5891_v15  ;;  %v2377_v45 = vrot.slane %v2349_v19, %v5891_v15  ;;  %v1917_v41 = vrot.slane %v1903_v29, %v5891_v15  ;;  %v1742_v37 = vrot.slane %v1663_v34, %v5891_v15  ;;  %v5654_v34 = vld [vmem:[%s6989_s3 + $0x238] sm:$0xff]   ;;  %v5664_v29 = vld [vmem:[%s6990_s4 + $0xc8] sm:$0xff]  }
 0x2d4   : > { %5304 = vmatpush3.bf16.msra.mxu0 %v5642_v8  ;;  %5283 = vmatprep.subr.bf16.mxu1 %v5643_v12  ;;  %v1833_v31 = vrot.slane %v1819_v11, %v5891_v15  ;;  %v1910_v36 = vrot.slane %v1665_v43, %v5891_v15  ;;  %v2002_v16 = vcombine.high %v1994_v48, %v1994_v48  ;;  %v2152_v49 = vshrl.u32 %v2001_v50, 16  ;;  %v5667_v11 = vld [vmem:[%s6990_s4 + $0x50] sm:$0xff]  }
 0x2d5   : > { %5305 = vmatprep.subr.bf16.mxu0 %v5644_v13  ;;  %v2379_v51 = vcombine.high %v2356_v18, %v2370_v44  ;;  %v2381_v53 = vcombine.high %v2363_v9, %v2377_v45  ;;  %v2378_v55 = vcombine.low %v2356_v18, %v2370_v44  ;;  %v2380_v26 = vcombine.low %v2363_v9, %v2377_v45  ;;  %v5653_v44 = vld [vmem:[%s6989_s3 + $0x230] sm:$0xff]  }
 0x2d6   : > { %v1826_v59 = vrot.slane %v1664_v54, %v5891_v15  ;;  %v2035_v63 = vshrl.u32 %v1749_v58, 16  ;;  %v2113_v0 = vshrl.u32 %v1917_v41, 16  ;;  %v1750_v39 = vcombine.high %v1742_v37, %v1742_v37  ;;  %v5660_v54 = vld [vmem:[%s6990_s4 + $0xc0] sm:$0xff]   ;;  %v5668_v48 = vld [vmem:[%s6990_s4 + $0xd0] sm:$0xff]   ;;  %v5672_v37 = vld [vmem:[%s6990_s4 + $0xd8] sm:$0xff]  }
 0x2d7   : > { %5284 = vmatpush3.bf16.msra.mxu1 %v5645_v20  ;;  %2954 = vmatprep.mubr.bf16.mxu1 %v2379_v51  ;;  %v1918_v56 = vcombine.high %v1910_v36, %v1910_v36  ;;  %v2074_v46 = vshrl.u32 %v1833_v31, 16  ;;  %v2147_v38 = vshrl.u32 %v2002_v16, 16  ;;  %v2154_v57 = vrot.slane %v2152_v49, 7  ;;  %v5675_v36 = vld [vmem:[%s6990_s4 + $0x60] sm:$0xff]  }
 0x2d8   : > { %2995 = vmatprep.mubr.bf16.mxu0 %v2381_v53  ;;  %5306 = vmatpush3.bf16.msra.mxu0 %v5646_v52  ;;  %v2155_v62 = vshll.u32 %v2001_v50, 16  ;;  %v1834_v35 = vcombine.high %v1826_v59, %v1826_v59  ;;  %v2037_v1 = vrot.slane %v2035_v63, 7  ;;  %v2115_v42 = vrot.slane %v2113_v0, 7  ;;  %v5669_v50 = vld [vmem:[%s6990_s4 + $0x10] sm:$0xff]   ;;  %v5676_v16 = vld [vmem:[%s6990_s4 + $0xe0] sm:$0xff]   ;;  %v5679_v63 = vld [vmem:[%s6990_s4 + $0x68] sm:$0xff]  }
 0x2d9   : > { %5431 = vmatprep.subr.bf16.mxu1 %v5775_v2  ;;  %v2030_v25 = vshrl.u32 %v1750_v39, 16  ;;  %v2038_v28 = vshll.u32 %v1749_v58, 16  ;;  %v2076_v4 = vrot.slane %v2074_v46, 7  ;;  %v2108_v5 = vshrl.u32 %v1918_v56, 16  ;;  %v5670_v58 = vld [vmem:[%s6990_s4 + $0x90] sm:$0xff]   ;;  %v5677_v49 = vld [vmem:[%s6990_s4 + $0x20] sm:$0xff]  }
 0x2da   : > { %2955 = vmatmul.mubr.bf16.vlgmr.msra.gmra.mrb[8].mxu1 %v2378_v55  ;;  %v2116_v6 = vshll.u32 %v1917_v41, 16  ;;  %v4962_v60 = vrot.slane %v2147_v38, 9  ;;  %v2157_v7 = vor.u32 %v2155_v62, %v2154_v57  ;;  %v2069_v12 = vshrl.u32 %v1834_v35, 16  ;;  %v5661_v55 = vld [vmem:[%s6990_s4] sm:$0xff]   ;;  %v5671_v41 = vld [vmem:[%s6990_s4 + $0x58] sm:$0xff]   ;;  %v5680_v0 = vld [vmem:[%s6990_s4 + $0xe8] sm:$0xff]  }
 0x2db   : > { %5432 = vmatpush3.bf16.msra.mxu1 %v5647_v21  ;;  %5447 = vmatprep.mubr.msk.bf16.mxu1 %vm5778_vm0, %v5775_v2  ;;  %v2040_v8 = vor.u32 %v2038_v28, %v2037_v1  ;;  %v2077_v13 = vshll.u32 %v1833_v31, 16  ;;  %v4953_v14 = vrot.slane %v2030_v25, 9  ;;  %v4959_v18 = vrot.slane %v2108_v5, 9  ;;  %v5659_v21 = vld [vmem:[%s6990_s4 + $0x40] sm:$0xff]   ;;  %v5674_v31 = vld [vmem:[%s6990_s4 + $0x98] sm:$0xff]   ;;  %v5681_v39 = vld [vmem:[%s6990_s4 + $0x28] sm:$0xff]  }
 0x2dc   : > { %2996 = vmatmul.mubr.bf16.vlgmr.msra.gmra.mrb[12].mxu0 %v2380_v26  ;;  %5433 = vmatprep.subr.bf16.mxu1 %v5775_v2  ;;  %v2118_v61 = vor.u32 %v2116_v6, %v2115_v42  ;;  %v4956_v9 = vrot.slane %v2069_v12, 9  ;;  %v2158_v24 = vsel %vm6083_vm11, %v4962_v60, %v2157_v7  ;;  %v5665_v26 = vld [vmem:[%s6990_s4 + $0x8] sm:$0xff]   ;;  %v5678_v59 = vld [vmem:[%s6990_s4 + $0xa0] sm:$0xff]   ;;  %v5683_v56 = vld [vmem:[%s6990_s4 + $0x70] sm:$0xff]  }
 0x2dd   : > { %v2079_v17 = vor.u32 %v2077_v13, %v2076_v4  ;;  %v2041_v19 = vsel %vm6083_vm11, %v4953_v14, %v2040_v8  ;;  %5322 = vmatprep.subr.bf16.mxu0 %v5659_v21  ;;  %v5684_v46 = vld [vmem:[%s6990_s4 + $0xf0] sm:$0xff]   ;;  %v5687_v62 = vld [vmem:[%s6990_s4 + $0x78] sm:$0xff]   ;;  %v5711_v25 = vld [vmem:[%s6990_s4 + $0x140] sm:$0xff]  }
 0x2de   : > { %v2119_v20 = vsel %vm6083_vm11, %v4959_v18, %v2118_v61  ;;  %5323 = vmatpush3.bf16.msra.mxu0 %v5661_v55  ;;  %v5685_v38 = vld [vmem:[%s6990_s4 + $0x30] sm:$0xff]   ;;  %v5688_v35 = vld [vmem:[%s6990_s4 + $0xf8] sm:$0xff]   ;;  %v4963_v5 = vld [vmem:[%s6993_s7] ss:$0 sm:$0xff] }
 0x2df   : > { %5434 = vmatpush3.bf16.msra.mxu1 %v5648_v22  ;;  %v2080_v45 = vsel %vm6083_vm11, %v4956_v9, %v2079_v17  ;;  %v2383_v52 = vcombine.low %v2119_v20, %v2158_v24  ;;  %v5666_v22 = vld [vmem:[%s6990_s4 + $0x88] sm:$0xff]   ;;  %5324 = vmatprep.subr.bf16.mxu0 %v5663_v40  ;;  %v5686_v57 = vld [vmem:[%s6990_s4 + $0xb0] sm:$0xff]   ;;  %v5689_v1 = vld [vmem:[%s6990_s4 + $0x38] sm:$0xff]  }
 0x2e0   : > { %5435 = vmatprep.subr.bf16.mxu1 %v5775_v2  ;;  %v2382_v30 = vcombine.low %v2041_v19, %v2080_v45  ;;  %v5690_v42 = vld [vmem:[%s6990_s4 + $0xb8] sm:$0xff]  }
 0x2e1   : > { %v2397_v51 = vrot.slane %v2383_v52, %v5891_v15 }
 0x2e2   : > { %v2390_v43 = vrot.slane %v2382_v30, %v5891_v15  ;;  %5325 = vmatpush3.bf16.msra.mxu0 %v5665_v26 }
 0x2e3   : > { %5436 = vmatpush3.bf16.msra.mxu1 %v5649_v47  ;;  %5326 = vmatprep.subr.bf16.mxu0 %v5667_v11  ;;  %v5673_v47 = vld [vmem:[%s6990_s4 + $0x18] sm:$0xff]  }
 0x2e4   : > { %5437 = vmatprep.subr.bf16.mxu1 %v5775_v2  ;;  %v2398_v53 = vcombine.low %v2390_v43, %v2397_v51 }
 0x2e6   : > { %5327 = vmatpush3.bf16.msra.mxu0 %v5669_v50 }
 0x2e7   : > { %5438 = vmatpush3.bf16.msra.mxu1 %v5650_v23  ;;  %5328 = vmatprep.subr.bf16.mxu0 %v5671_v41  ;;  %v5682_v23 = vld [vmem:[%s6990_s4 + $0xa8] sm:$0xff]  }
 0x2e8   : > { %5439 = vmatprep.subr.bf16.mxu1 %v5775_v2 }
 0x2ea   : > { %5329 = vmatpush3.bf16.msra.mxu0 %v5673_v47  ;;  %v6650_v47 = vld [vmem:[#allocation3 + $0x2c] sm:$0x3] }
 0x2eb   : > { %5440 = vmatpush3.bf16.msra.mxu1 %v5651_v3  ;;  %5330 = vmatprep.subr.bf16.mxu0 %v5675_v36  ;;  %v5712_v3 = vld [vmem:[%s6990_s4 + $0x1c0] sm:$0xff]  }
 0x2ec   : > { %5441 = vmatprep.subr.bf16.mxu1 %v5775_v2 }
 0x2ee   : > { %5331 = vmatpush3.bf16.msra.mxu0 %v5677_v49  ;;  %v5068_v49 = vcombine.low %v6650_v47, %v6650_v47 }
 0x2ef   : > { %5442 = vmatpush3.bf16.msra.mxu1 %v5652_v27  ;;  %5332 = vmatprep.subr.bf16.mxu0 %v5679_v63 }
 0x2f0   : > { %5443 = vmatprep.subr.bf16.mxu1 %v5775_v2 }
 0x2f2   : > { %5333 = vmatpush3.bf16.msra.mxu0 %v5681_v39  ;;  %v6655_v39 = vld [vmem:[#allocation3 + $0x8] sm:$0x8] }
 0x2f3   : > { %5444 = vmatpush3.bf16.msra.mxu1 %v5653_v44  ;;  %5334 = vmatprep.subr.bf16.mxu0 %v5683_v56 }
 0x2f4   : > { %5445 = vmatprep.subr.bf16.mxu1 %v5775_v2 }
 0x2f6   : > { %5335 = vmatpush3.bf16.msra.mxu0 %v5685_v38 }
 0x2f7   : > { %5446 = vmatpush3.bf16.msra.mxu1 %v5654_v34  ;;  %5336 = vmatprep.subr.bf16.mxu0 %v5687_v62  ;;  %v3319_v62 = vshrl.u32 %v5068_v49, 16 }
 0x2f8   : > { %5344 = vmatprep.subr.bf16.mxu1 %v5660_v54 }
 0x2fa   : > { %5448 = vmatmul.mubr.bf16.vlgmr.msra.gmra.mrb[12].mxu1 %v2398_v53  ;;  %5337 = vmatpush3.bf16.msra.mxu0 %v5689_v1 }
 0x2fb   : > { %5345 = vmatpush3.bf16.msra.mxu1 %v5662_v32  ;;  %5366 = vmatprep.subr.bf16.mxu0 %v5711_v25 }
 0x2fc   : > { %5346 = vmatprep.subr.bf16.mxu1 %v5664_v29 }
 0x2ff   : > { %5347 = vmatpush3.bf16.msra.mxu1 %v5666_v22  ;;  %v3091_v22 = vld [vmem:[#allocation3 + $0x4] sm:$0x3] }
 0x300   : > { %5348 = vmatprep.subr.bf16.mxu1 %v5668_v48  ;;  %v5041_v11 = vcombine.low %v3091_v22, %v3091_v22 }
 0x302   : > { %v3151_v48 = vshrl.u32 %v5041_v11, 16  ;;  %v3154_v50 = vshll.u32 %v5041_v11, 16 }
 0x303   : > { %5349 = vmatpush3.bf16.msra.mxu1 %v5670_v58 }
 0x304   : > { %5350 = vmatprep.subr.bf16.mxu1 %v5672_v37  ;;  %v3153_v58 = vrot.slane %v3151_v48, 4  ;;  %v3156_v41 = vrot.slane %v3154_v50, 5  ;;  %v6648_v37 = vld [vmem:[#allocation3 + $0x4] ss:$0 sps:$4 sm:$0x77]  }
 0x306   : > { %v3157_v36 = vor.u32 %v3156_v41, %v3153_v58 }
 0x307   : > { %5351 = vmatpush3.bf16.msra.mxu1 %v5674_v31 }
 0x308   : > { %5352 = vmatprep.subr.bf16.mxu1 %v5676_v16  ;;  %v3194_v16 = vrot.slane %v6648_v37, 5 }
 0x30b   : > { %5353 = vmatpush3.bf16.msra.mxu1 %v5678_v59 }
 0x30c   : > { %5354 = vmatprep.subr.bf16.mxu1 %v5680_v0  ;;  %v3090_v0 = vld [vmem:[#allocation3] sm:$0x8] }
 0x30d   : > { %v5073_v56 = vcombine.low %v3090_v0, %v3157_v36 }
 0x30f   : > { %5355 = vmatpush3.bf16.msra.mxu1 %v5682_v23  ;;  %v3352_v25 = vrot.slane %v5073_v56, %v5891_v15 }
 0x310   : > { %5356 = vmatprep.subr.bf16.mxu1 %v5684_v46  ;;  %v5074_v46 = vcombine.low %v3194_v16, %v6655_v39 }
 0x313   : > { %5357 = vmatpush3.bf16.msra.mxu1 %v5686_v57 }
 0x314   : > { %5358 = vmatprep.subr.bf16.mxu1 %v5688_v35  ;;  %v3322_v35 = vshll.u32 %v5068_v49, 16 }
 0x317   : > { %5359 = vmatpush3.bf16.msra.mxu1 %v5690_v42 }
 0x318   : > { %5388 = vmatprep.subr.bf16.mxu1 %v5712_v3  ;;  %v3366_v3 = vrot.slane %v5074_v46, %v5891_v15 }
 0x38d   : > { %v5241_v28 = vpop.f32.mrb[4].mxu1  ;;  %v5263_v4 = vpop.f32.mrb[8].mxu0 }
 0x38e   : > { %v5242_v6 = vpop.f32.mrb[5].mxu1  ;;  %v5264_v60 = vpop.f32.mrb[9].mxu0 }
 0x38f   : > { %v5243_v7 = vadd.f32 %v5242_v6, %v5241_v28  ;;  %v5265_v8 = vadd.f32 %v5264_v60, %v5263_v4  ;;  %v5244_v12 = vpop.f32.mrb[6].mxu1  ;;  %v5266_v13 = vpop.f32.mrb[10].mxu0  ;;  %v3324_v6 = vrot.slane %v3322_v35, 5 }
 0x390   : > { %v5245_v61 = vpop.f32.mrb[7].mxu1  ;;  %v5267_v27 = vpop.f32.mrb[11].mxu0 }
 0x391   : > { %v2875_v14 = vadd.f32 %v5243_v7, %v4963_v5  ;;  %v5246_v17 = vadd.f32 %v5245_v61, %v5244_v12  ;;  %v5268_v18 = vadd.f32 %v5267_v27, %v5266_v13 }
 0x393   : > { %v2916_v19 = vadd.f32 %v5265_v8, %v2875_v14  ;;  %v2878_v9 = vadd.f32 %v5246_v17, %v4963_v5  ;;  %v3321_v5 = vrot.slane %v3319_v62, 4  ;;  %v3374_v8 = vcombine.high %v3352_v25, %v3366_v3  ;;  %v3078_v14 = vld [vmem:[#allocation3 + $0xc] sm:$0x7]  ;;  %v3084_v17 = vld [vmem:[#allocation3 + $0x1c] sm:$0x7] }
 0x395   : > { %v2919_v20 = vadd.f32 %v5268_v18, %v2878_v9 }
 0x3ad   : > { %v5285_v24 = vpop.f32.mrb[8].mxu1 }
 0x3ae   : > { %v5286_v44 = vpop.f32.mrb[9].mxu1 }
 0x3af   : > { %v5307_v45 = vpop.f32.mrb[12].mxu0  ;;  %v5287_v30 = vadd.f32 %v5286_v44, %v5285_v24  ;;  %v5288_v52 = vpop.f32.mrb[10].mxu1  ;;  %v3325_v24 = vor.u32 %v3324_v6, %v3321_v5 }
 0x3b0   : > { %v5308_v34 = vpop.f32.mrb[13].mxu0  ;;  %v5289_v43 = vpop.f32.mrb[11].mxu1 }
 0x3b1   : > { %v2957_v51 = vadd.f32 %v5287_v30, %v2916_v19  ;;  %v5309_v53 = vadd.f32 %v5308_v34, %v5307_v45  ;;  %v5310_v21 = vpop.f32.mrb[14].mxu0  ;;  %v5290_v54 = vadd.f32 %v5289_v43, %v5288_v52  ;;  %v3081_v19 = vld [vmem:[#allocation3 + $0x14] sm:$0x7]  ;;  %v3087_v30 = vld [vmem:[#allocation3 + $0x24] sm:$0x7] }
 0x3b2   : > { %v5311_v55 = vpop.f32.mrb[15].mxu0  ;;  %v3120_v52 = vld [vmem:[#allocation3 + $0x28] sm:$0x8] }
 0x3b3   : > { %v2960_v32 = vadd.f32 %v5290_v54, %v2919_v20  ;;  %v5312_v40 = vadd.f32 %v5311_v55, %v5310_v21  ;;  %v2998_v29 = vadd.f32 %v5309_v53, %v2957_v51  ;;  %v5037_v20 = vcombine.low %v3090_v0, %v3091_v22  ;;  %v3092_v55 = vld [vmem:[#allocation3 + $0x8] sm:$0x8]  ;;  %v6685_v22 = vld [vmem:[#allocation3 + $0x20] sm:$0x8] }
 0x3b4   : > { %v3679_v51 = vshrl.u32 %v3374_v8, 16  ;;  %v5064_v21 = vcombine.low %v3120_v52, %v6650_v47  ;;  %v5084_v54 = vcombine.low %v3120_v52, %v3325_v24 }
 0x3b5   : > { %v3001_v26 = vadd.f32 %v5312_v40, %v2960_v32  ;;  %v6676_v53 = vcombine.high %v5037_v20, %v3157_v36  ;;  %v6679_v32 = vld [vmem:[#allocation3 + $0x10] sm:$0x8]  ;;  %v6681_v40 = vld [vmem:[#allocation3 + $0x18] sm:$0x8] }
 0x3b6   : > { %v6687_v33 = vrot.slane %v3679_v51, 9  ;;  %v6693_v58 = vcombine.high %v5064_v21, %v3325_v24  ;;  %v6696_v41 = vrot.slane %v5084_v54, %v5891_v15 }
 0x3b7   : > { %v3359_v50 = vrot.slane %v6676_v53, %v5891_v15 }
 0x3cd   : > { %v3038_v31 = vpop.f32.mrb[12].mxu1 }
 0x3ce   : > { %v3039_v59 = vadd.f32 %v3038_v31, %v2998_v29  ;;  %v5449_v63 = vpop.f32.mrb[13].mxu1  ;;  %v3104_v29 = vld [vmem:[#allocation3 + $0x10] sm:$0x8] }
 0x3cf   : > { %v3041_v23 = vpop.f32.mrb[14].mxu1 }
 0x3d0   : > { %v3042_v38 = vadd.f32 %v3041_v23, %v3001_v26  ;;  %v5450_v57 = vpop.f32.mrb[15].mxu1  ;;  %v3045_v1 = vmax.f32 %v3039_v59, 0.0  ;;  %v6683_v26 = vld [vmem:[#allocation3 + $0x18] sm:$0x8] }
 0x3d2   : > { %v3046_v42 = vmax.f32 %v3042_v38, 0.0 }
 0x3d4   : > { %v3047_v28 = vpack.c.bf16 %v3046_v42, %v3045_v1  ;;  %v5036_v4 = vpack.c.bf16 %v3046_v42, %v3046_v42 }
 0x3d6   : > { %v3056_v60 = vrot.slane %v3047_v28, %v5891_v15  ;;  %v3063_v7 = vrot.slane %v5036_v4, %v5891_v15 }
 0x3d8   : > { %v3064_v12 = vcombine.high %v3056_v60, %v3056_v60  ;;  %v3065_v13 = vcombine.high %v3063_v7, %v3063_v7  ;;  %v3067_v61 = vsel %vm1387_vm15, %v3056_v60, 0  ;;  %v3073_v27 = vsel %vm1387_vm15, %v3063_v7, 0 }
 0x3d9   : > { %v3079_v18 = vsel %vm6099_vm14, %v3067_v61, %v3078_v14  ;;  %v3085_v9 = vsel %vm6099_vm14, %v3073_v27, %v3084_v17 }
 0x3da   : > { %v3070_v44 = vsel %vm1387_vm15, %v3064_v12, 0  ;;  %v3076_v45 = vsel %vm1387_vm15, %v3065_v13, 0  ;;  %3080 = vst [vmem:[#allocation3 + $0xc] sm:$0x7] %v3079_v18  ;;  %3086 = vst [vmem:[#allocation3 + $0x1c] sm:$0x7] %v3085_v9 }
 0x3db   : > { %v3082_v34 = vsel %vm6099_vm14, %v3070_v44, %v3081_v19  ;;  %v3088_v43 = vsel %vm6099_vm14, %v3076_v45, %v3087_v30 }
 0x3dc   : > { %3083 = vst [vmem:[#allocation3 + $0x14] sm:$0x7] %v3082_v34  ;;  %3089 = vst [vmem:[#allocation3 + $0x24] sm:$0x7] %v3088_v43 }
 0x3e1   : > { %v3093_v11 = vld [vmem:[#allocation3 + $0xc] sm:$0x3]  ;;  %v6689_v48 = vld [vmem:[#allocation3 + $0x1c] sm:$0x3] }
 0x3e2   : > { %v3103_v47 = vld [vmem:[#allocation3 + $0xc] sm:$0x3]  ;;  %v3107_v31 = vld [vmem:[#allocation3 + $0x1c] sm:$0x3]  ;;  %v5038_v36 = vcombine.low %v3092_v55, %v3093_v11  ;;  %v5040_v49 = vcombine.low %v6681_v40, %v6689_v48  ;;  %v5042_v59 = vcombine.low %v3093_v11, %v3093_v11  ;;  %v5044_v63 = vcombine.low %v6689_v48, %v6689_v48 }
 0x3e3   : > { %v3095_v0 = vld [vmem:[#allocation3 + $0x14] sm:$0x3]  ;;  %v5049_v56 = vcombine.low %v6655_v39, %v3103_v47  ;;  %v5051_v46 = vcombine.low %v6683_v26, %v3107_v31  ;;  %v6704_v38 = vcombine.low %v3103_v47, %v3103_v47  ;;  %v6706_v57 = vcombine.low %v3107_v31, %v3107_v31  ;;  %v3109_v62 = vld [vmem:[#allocation3 + $0x24] sm:$0x3] }
 0x3e4   : > { %v3105_v23 = vld [vmem:[#allocation3 + $0x14] sm:$0x3]  ;;  %v5039_v35 = vcombine.low %v6679_v32, %v3095_v0  ;;  %v5043_v1 = vcombine.low %v3095_v0, %v3095_v0  ;;  %v3159_v42 = vshrl.u32 %v5042_v59, 16  ;;  %v3162_v25 = vshll.u32 %v5042_v59, 16 }
 0x3e5   : > { %v3175_v3 = vshrl.u32 %v5044_v63, 16  ;;  %v3178_v28 = vshll.u32 %v5044_v63, 16  ;;  %v5700_v4 = vld [vmem:[#allocation3 + $0xc] ss:$0 sps:$4 sm:$0x77]   ;;  %v5050_v5 = vcombine.low %v3104_v29, %v3105_v23  ;;  %v5052_v6 = vcombine.low %v6685_v22, %v3109_v62 }
 0x3e6   : > { %v3161_v60 = vrot.slane %v3159_v42, 4  ;;  %v3164_v39 = vrot.slane %v3162_v25, 5  ;;  %v3167_v7 = vshrl.u32 %v5043_v1, 16  ;;  %v3170_v8 = vshll.u32 %v5043_v1, 16 }
 0x3e7   : > { %v3177_v12 = vrot.slane %v3175_v3, 4  ;;  %v3180_v13 = vrot.slane %v3178_v28, 5  ;;  %v5701_v61 = vld [vmem:[#allocation3 + $0x14] ss:$0 sps:$4 sm:$0x77]   ;;  %v3195_v27 = vrot.slane %v5700_v4, 5  ;;  %v6710_v14 = vcombine.low %v3105_v23, %v3105_v23 }
 0x3e8   : > { %v3165_v17 = vor.u32 %v3164_v39, %v3161_v60  ;;  %v3169_v18 = vrot.slane %v3167_v7, 4  ;;  %v3172_v19 = vrot.slane %v3170_v8, 5  ;;  %v5702_v9 = vld [vmem:[#allocation3 + $0x1c] ss:$0 sps:$4 sm:$0x77]   ;;  %v6712_v20 = vcombine.low %v3109_v62, %v3109_v62 }
 0x3e9   : > { %v3181_v24 = vor.u32 %v3180_v13, %v3177_v12  ;;  %v3196_v44 = vrot.slane %v5701_v61, 5  ;;  %v3345_v45 = vcombine.high %v3194_v16, %v5049_v56  ;;  %v5077_v30 = vcombine.low %v3195_v27, %v3104_v29 }
 0x3ea   : > { %v3173_v52 = vor.u32 %v3172_v19, %v3169_v18  ;;  %v3197_v34 = vrot.slane %v5702_v9, 5  ;;  %v5076_v43 = vcombine.low %v3092_v55, %v3165_v17  ;;  %v3427_v51 = vcombine.high %v5038_v36, %v3165_v17 }
 0x3eb   : > { %v3373_v53 = vrot.slane %v3345_v45, %v5891_v15  ;;  %v3429_v21 = vcombine.high %v3195_v27, %v5050_v5  ;;  %v3450_v54 = vrot.slane %v5077_v30, %v5891_v15  ;;  %v5080_v11 = vcombine.low %v3196_v44, %v6683_v26 }
 0x3ec   : > { %v3436_v48 = vrot.slane %v5076_v43, %v5891_v15  ;;  %v3443_v47 = vrot.slane %v3427_v51, %v5891_v15  ;;  %v5079_v31 = vcombine.low %v6679_v32, %v3173_v52  ;;  %v3511_v37 = vcombine.high %v5039_v35, %v3173_v52 }
 0x3ed   : > { %v3375_v16 = vcombine.low %v3359_v50, %v3373_v53  ;;  %v3457_v29 = vrot.slane %v3429_v21, %v5891_v15  ;;  %v3513_v59 = vcombine.high %v3196_v44, %v5051_v46  ;;  %v3534_v55 = vrot.slane %v5080_v11, %v5891_v15 }
 0x3ee   : > { %v3458_v36 = vcombine.high %v3436_v48, %v3450_v54  ;;  %v3520_v63 = vrot.slane %v5079_v31, %v5891_v15  ;;  %v3527_v0 = vrot.slane %v3511_v37, %v5891_v15  ;;  %v5082_v26 = vcombine.low %v6681_v40, %v3181_v24 }
 0x3ef   : > { %v3459_v23 = vcombine.low %v3443_v47, %v3457_v29  ;;  %v3541_v56 = vrot.slane %v3513_v59, %v5891_v15  ;;  %v3595_v62 = vcombine.high %v5040_v49, %v3181_v24  ;;  %v5083_v32 = vcombine.low %v3197_v34, %v6685_v22  ;;  %v5715_v29 = vld [vmem:[#allocation3 + $0xc] ss:$0 sps:$4 sm:$0x77]   ;;  %v6745_v59 = vld [vmem:[#allocation3 + $0x10] sm:$0x8] }
 0x3f0   : > { %v3542_v35 = vcombine.high %v3520_v63, %v3534_v55  ;;  %v3597_v50 = vcombine.high %v3197_v34, %v5052_v6  ;;  %v3604_v1 = vrot.slane %v5082_v26, %v5891_v15  ;;  %v3684_v46 = vshrl.u32 %v3375_v16, 16 }
 0x3f1   : > { %v3543_v42 = vcombine.low %v3527_v0, %v3541_v56  ;;  %v3611_v25 = vrot.slane %v3595_v62, %v5891_v15  ;;  %v3618_v3 = vrot.slane %v5083_v32, %v5891_v15  ;;  %v3687_v28 = vshll.u32 %v3375_v16, 16  ;;  %v6759_v32 = vld [vmem:[#allocation3 + $0x1c] ss:$0 sps:$4 sm:$0x77]  }
 0x3f2   : > { %v3625_v4 = vrot.slane %v3597_v50, %v5891_v15  ;;  %v3686_v40 = vrot.slane %v3684_v46, 7  ;;  %v3718_v5 = vshrl.u32 %v3458_v36, 16  ;;  %v3723_v60 = vshrl.u32 %v3459_v23, 16 }
 0x3f3   : > { %v3626_v39 = vcombine.high %v3604_v1, %v3618_v3  ;;  %v3726_v49 = vshll.u32 %v3459_v23, 16  ;;  %v3757_v7 = vshrl.u32 %v3542_v35, 16  ;;  %v3762_v22 = vshrl.u32 %v3543_v42, 16  ;;  %v6756_v23 = vld [vmem:[#allocation3 + $0x18] sm:$0x8] }
 0x3f4   : > { %v3627_v8 = vcombine.low %v3611_v25, %v3625_v4  ;;  %v3689_v6 = vor.u32 %v3687_v28, %v3686_v40  ;;  %v5088_v12 = vrot.slane %v3718_v5, 9  ;;  %v3725_v13 = vrot.slane %v3723_v60, 7  ;;  %v6763_v1 = vld [vmem:[#allocation3 + $0x1c] sm:$0x3]  ;;  %v6765_v25 = vld [vmem:[#allocation3 + $0x20] sm:$0x8] }
 0x3f5   : > { %v5091_v61 = vrot.slane %v3757_v7, 9  ;;  %v3764_v27 = vrot.slane %v3762_v22, 7  ;;  %v3765_v17 = vshll.u32 %v3543_v42, 16  ;;  %v3796_v18 = vshrl.u32 %v3626_v39, 16  ;;  %v6770_v39 = vld [vmem:[#allocation3 + $0x24] sm:$0x3] }
 0x3f6   : > { %v3690_v19 = vsel %vm6083_vm11, %v6687_v33, %v3689_v6  ;;  %v3728_v9 = vor.u32 %v3726_v49, %v3725_v13  ;;  %v3801_v24 = vshrl.u32 %v3627_v8, 16  ;;  %v3804_v44 = vshll.u32 %v3627_v8, 16  ;;  %v6772_v7 = vld [vmem:[#allocation3 + $0x24] ss:$0 sps:$4 sm:$0x77]  }
 0x3f7   : > { %v3767_v45 = vor.u32 %v3765_v17, %v3764_v27  ;;  %v5094_v30 = vrot.slane %v3796_v18, 9  ;;  %v3223_v52 = vshrl.u32 %v6704_v38, 16  ;;  %v3226_v34 = vshll.u32 %v6704_v38, 16  ;;  %v5713_v18 = vld [vmem:[%s6990_s4 + $0x100] sm:$0xff]  }
 0x3f8   : > { %v3729_v43 = vsel %vm6083_vm11, %v5088_v12, %v3728_v9  ;;  %v3803_v51 = vrot.slane %v3801_v24, 7  ;;  %v3231_v53 = vshrl.u32 %v6710_v14, 16  ;;  %v3234_v21 = vshll.u32 %v6710_v14, 16  ;;  %v6749_v14 = vld [vmem:[#allocation3 + $0x14] ss:$0 sps:$4 sm:$0x77]  }
 0x3f9   : > { %v3768_v33 = vsel %vm6083_vm11, %v5091_v61, %v3767_v45  ;;  %v3985_v54 = vcombine.low %v3690_v19, %v3729_v43  ;;  %v3986_v11 = vcombine.high %v3690_v19, %v3729_v43  ;;  %v3225_v48 = vrot.slane %v3223_v52, 4  ;;  %v5714_v19 = vld [vmem:[%s6990_s4 + $0x180] sm:$0xff]   ;;  %v5728_v52 = vld [vmem:[%s6990_s4 + $0x1c8] sm:$0xff]  }
 0x3fa   : > { %v3806_v47 = vor.u32 %v3804_v44, %v3803_v51  ;;  %v3228_v31 = vrot.slane %v3226_v34, 5  ;;  %v3233_v37 = vrot.slane %v3231_v53, 4  ;;  %v3236_v16 = vrot.slane %v3234_v21, 5 }
 0x3fb   : > { %v3995_v38 = vrot.slane %v3985_v54, %v5891_v15  ;;  %v3239_v55 = vshrl.u32 %v6706_v57, 16  ;;  %v3242_v36 = vshll.u32 %v6706_v57, 16  ;;  %v3659_v63 = vrot.slane %v6693_v58, %v5891_v15  ;;  %v6761_v57 = vld [vmem:[#allocation3 + $0x14] sm:$0x3]  ;;  %v5743_v58 = vld [vmem:[%s6990_s4 + $0x168] sm:$0xff]  }
 0x3fc   : > { %v3807_v0 = vsel %vm6083_vm11, %v5094_v30, %v3806_v47  ;;  %v4002_v26 = vrot.slane %v3986_v11, %v5891_v15  ;;  %v3229_v56 = vor.u32 %v3228_v31, %v3225_v48  ;;  %v3247_v62 = vshrl.u32 %v6712_v20, 16  ;;  %v5727_v30 = vld [vmem:[%s6990_s4 + $0x148] sm:$0xff]  }
 0x3fd   : > { %v3987_v35 = vcombine.low %v3768_v33, %v3807_v0  ;;  %v3988_v50 = vcombine.high %v3768_v33, %v3807_v0  ;;  %v3241_v46 = vrot.slane %v3239_v55, 4  ;;  %v3244_v42 = vrot.slane %v3242_v36, 5 }
 0x3fe   : > { %v3237_v3 = vor.u32 %v3236_v16, %v3233_v37  ;;  %v3249_v28 = vrot.slane %v3247_v62, 4  ;;  %v3250_v4 = vshll.u32 %v6712_v20, 16  ;;  %v3266_v40 = vrot.slane %v5715_v29, 5  ;;  %v5729_v16 = vld [vmem:[%s6990_s4 + $0x108] sm:$0xff]  }
 0x3ff   : > { %v4009_v5 = vrot.slane %v3987_v35, %v5891_v15  ;;  %v4016_v60 = vrot.slane %v3988_v50, %v5891_v15  ;;  %v3245_v49 = vor.u32 %v3244_v42, %v3241_v46  ;;  %v3267_v22 = vrot.slane %v6749_v14, 5  ;;  %v5730_v14 = vld [vmem:[%s6990_s4 + $0x188] sm:$0xff]   ;;  %v5732_v46 = vld [vmem:[%s6990_s4 + $0x1d0] sm:$0xff]  }
 0x400   : > { %v3252_v8 = vrot.slane %v3250_v4, 5  ;;  %v3268_v6 = vrot.slane %v6759_v32, 5  ;;  %v5061_v12 = vcombine.low %v6745_v59, %v6761_v57  ;;  %v5062_v20 = vcombine.low %v6756_v23, %v6763_v1  ;;  %v5731_v32 = vld [vmem:[%s6990_s4 + $0x150] sm:$0xff]  }
 0x401   : > { %v4018_v13 = vcombine.high %v3995_v38, %v4009_v5  ;;  %v4020_v61 = vcombine.high %v4002_v26, %v4016_v60  ;;  %v4017_v27 = vcombine.low %v3995_v38, %v4009_v5  ;;  %v4019_v17 = vcombine.low %v4002_v26, %v4016_v60 }
 0x402   : > { %v6786_v9 = vor.u32 %v3252_v8, %v3249_v28  ;;  %v5063_v24 = vcombine.low %v6765_v25, %v6770_v39  ;;  %v5065_v44 = vcombine.low %v6761_v57, %v6761_v57  ;;  %v5066_v45 = vcombine.low %v6763_v1, %v6763_v1 }
 0x403   : > { %4547 = vmatprep.mubr.bf16.mxu0 %v4018_v13  ;;  %4588 = vmatprep.mubr.bf16.mxu1 %v4020_v61  ;;  %v3269_v34 = vrot.slane %v6772_v7, 5  ;;  %v5067_v43 = vcombine.low %v6770_v39, %v6770_v39  ;;  %v6803_v51 = vcombine.low %v3229_v56, %v3266_v40  ;;  %v6805_v53 = vcombine.high %v3229_v56, %v3266_v40  ;;  %v5734_v7 = vld [vmem:[%s6990_s4 + $0x190] sm:$0xff]  }
 0x404   : > { %4548 = vmatmul.mubr.bf16.vlgmr.msra.gmra.mrb[16].mxu0 %v4017_v27  ;;  %4589 = vmatmul.mubr.bf16.vlgmr.msra.gmra.mrb[16].mxu1 %v4019_v17  ;;  %v3295_v21 = vshrl.u32 %v5065_v44, 16  ;;  %v3298_v33 = vshll.u32 %v5065_v44, 16  ;;  %v3303_v54 = vshrl.u32 %v5066_v45, 16  ;;  %v3306_v11 = vshll.u32 %v5066_v45, 16 }
 0x405   : > { %5367 = vmatpush3.bf16.msra.mxu0 %v5713_v18  ;;  %5389 = vmatpush3.bf16.msra.mxu1 %v5714_v19  ;;  %v3311_v48 = vshrl.u32 %v5067_v43, 16  ;;  %v3314_v47 = vshll.u32 %v5067_v43, 16  ;;  %v3386_v31 = vrot.slane %v6803_v51, %v5891_v15  ;;  %v3393_v37 = vrot.slane %v6805_v53, %v5891_v15  ;;  %v5738_v43 = vld [vmem:[%s6990_s4 + $0x198] sm:$0xff]  }
 0x406   : > { %v3297_v29 = vrot.slane %v3295_v21, 4  ;;  %v3300_v38 = vrot.slane %v3298_v33, 5  ;;  %v3305_v55 = vrot.slane %v3303_v54, 4  ;;  %v3308_v36 = vrot.slane %v3306_v11, 5  ;;  %5368 = vmatprep.subr.bf16.mxu0 %v5727_v30  ;;  %5390 = vmatprep.subr.bf16.mxu1 %v5728_v52  ;;  %v5740_v33 = vld [vmem:[%s6990_s4 + $0x1e0] sm:$0xff]  }
 0x407   : > { %v3313_v0 = vrot.slane %v3311_v48, 4  ;;  %v3316_v26 = vrot.slane %v3314_v47, 5  ;;  %v3460_v56 = vcombine.low %v3237_v3, %v3267_v22  ;;  %v3461_v62 = vcombine.high %v3237_v3, %v3267_v22  ;;  %v5733_v3 = vld [vmem:[%s6990_s4 + $0x110] sm:$0xff]  }
 0x408   : > { %v3301_v35 = vor.u32 %v3300_v38, %v3297_v29  ;;  %v3309_v50 = vor.u32 %v3308_v36, %v3305_v55  ;;  %v3544_v57 = vcombine.low %v3245_v49, %v3268_v6  ;;  %v3545_v1 = vcombine.high %v3245_v49, %v3268_v6  ;;  %v5742_v55 = vld [vmem:[%s6990_s4 + $0x1a0] sm:$0xff]  }
 0x409   : > { %v3317_v42 = vor.u32 %v3316_v26, %v3313_v0  ;;  %v3470_v28 = vrot.slane %v3460_v56, %v5891_v15  ;;  %v3477_v4 = vrot.slane %v3461_v62, %v5891_v15  ;;  %v3628_v40 = vcombine.low %v6786_v9, %v3269_v34  ;;  %5369 = vmatpush3.bf16.msra.mxu0 %v5729_v16  ;;  %v5744_v26 = vld [vmem:[%s6990_s4 + $0x1e8] sm:$0xff]  }
 0x40a   : > { %v5075_v5 = vcombine.low %v6745_v59, %v3301_v35  ;;  %v3379_v60 = vcombine.high %v5061_v12, %v3301_v35  ;;  %v5078_v39 = vcombine.low %v6756_v23, %v3309_v50  ;;  %v3463_v49 = vcombine.high %v5062_v20, %v3309_v50  ;;  %5391 = vmatpush3.bf16.msra.mxu1 %v5730_v14  ;;  %v5735_v59 = vld [vmem:[%s6990_s4 + $0x158] sm:$0xff]  }
 0x40b   : > { %v5081_v22 = vcombine.low %v6765_v25, %v3317_v42  ;;  %v3547_v8 = vcombine.high %v5063_v24, %v3317_v42  ;;  %v3554_v6 = vrot.slane %v3544_v57, %v5891_v15  ;;  %v3561_v13 = vrot.slane %v3545_v1, %v5891_v15  ;;  %5370 = vmatprep.subr.bf16.mxu0 %v5731_v32  ;;  %v5736_v25 = vld [vmem:[%s6990_s4 + $0x1d8] sm:$0xff]  }
 0x40c   : > { %v3400_v23 = vrot.slane %v5075_v5, %v5891_v15  ;;  %v3407_v12 = vrot.slane %v3379_v60, %v5891_v15  ;;  %v3484_v20 = vrot.slane %v5078_v39, %v5891_v15  ;;  %v3491_v61 = vrot.slane %v3463_v49, %v5891_v15  ;;  %5392 = vmatprep.subr.bf16.mxu1 %v5732_v46  ;;  %v5737_v24 = vld [vmem:[%s6990_s4 + $0x118] sm:$0xff]   ;;  %v5745_v46 = vld [vmem:[%s6990_s4 + $0x128] sm:$0xff]   ;;  %v5747_v5 = vld [vmem:[%s6990_s4 + $0x170] sm:$0xff]  }
 0x40d   : > { %v3568_v27 = vrot.slane %v5081_v22, %v5891_v15  ;;  %v3575_v17 = vrot.slane %v3547_v8, %v5891_v15  ;;  %v3629_v18 = vcombine.high %v6786_v9, %v3269_v34  ;;  %v3638_v19 = vrot.slane %v3628_v40, %v5891_v15  ;;  %5371 = vmatpush3.bf16.msra.mxu0 %v5733_v3  ;;  %v5739_v9 = vld [vmem:[%s6990_s4 + $0x160] sm:$0xff]   ;;  %v5746_v3 = vld [vmem:[%s6990_s4 + $0x1a8] sm:$0xff]   ;;  %v5748_v49 = vld [vmem:[%s6990_s4 + $0x1f0] sm:$0xff]  }
 0x40e   : > { %v3408_v44 = vcombine.high %v3386_v31, %v3400_v23  ;;  %v3409_v45 = vcombine.low %v3393_v37, %v3407_v12  ;;  %v3492_v30 = vcombine.high %v3470_v28, %v3484_v20  ;;  %v3493_v52 = vcombine.low %v3477_v4, %v3491_v61  ;;  %5393 = vmatpush3.bf16.msra.mxu1 %v5734_v7  ;;  %v5750_v23 = vld [vmem:[%s6990_s4 + $0x1b0] sm:$0xff]   ;;  %v5751_v12 = vld [vmem:[%s6990_s4 + $0x178] sm:$0xff]  }
 0x40f   : > { %v3576_v34 = vcombine.high %v3554_v6, %v3568_v27  ;;  %v3577_v51 = vcombine.low %v3561_v13, %v3575_v17  ;;  %v3645_v53 = vrot.slane %v3629_v18, %v5891_v15  ;;  %v3660_v21 = vcombine.high %v3638_v19, %v6696_v41  ;;  %5372 = vmatprep.subr.bf16.mxu0 %v5735_v59  ;;  %v5741_v41 = vld [vmem:[%s6990_s4 + $0x120] sm:$0xff]   ;;  %v5749_v13 = vld [vmem:[%s6990_s4 + $0x130] sm:$0xff]   ;;  %v5752_v17 = vld [vmem:[%s6990_s4 + $0x1f8] sm:$0xff]  }
 0x410   : > { %v3692_v54 = vshrl.u32 %v3408_v44, 16  ;;  %v3697_v11 = vshrl.u32 %v3409_v45, 16  ;;  %5394 = vmatprep.subr.bf16.mxu1 %v5736_v25  ;;  %v3731_v47 = vshrl.u32 %v3492_v30, 16  ;;  %v3736_v31 = vshrl.u32 %v3493_v52, 16  ;;  %v5753_v30 = vld [vmem:[%s6990_s4 + $0x138] sm:$0xff]  }
 0x411   : > { %v3661_v48 = vcombine.low %v3645_v53, %v3659_v63  ;;  %v3770_v37 = vshrl.u32 %v3576_v34, 16  ;;  %5373 = vmatpush3.bf16.msra.mxu0 %v5737_v24  ;;  %v3700_v29 = vshll.u32 %v3409_v45, 16  ;;  %v3775_v38 = vshrl.u32 %v3577_v51, 16  ;;  %v5766_v18 = vld [vmem:[#allocation3 + $0x2c] ss:$0 sps:$4 sm:$0x77]  }
 0x412   : > { %v3699_v16 = vrot.slane %v3697_v11, 7  ;;  %5395 = vmatpush3.bf16.msra.mxu1 %v5738_v43  ;;  %5374 = vmatprep.subr.bf16.mxu0 %v5739_v9  ;;  %v5086_v63 = vrot.slane %v3692_v54, 9  ;;  %v3738_v36 = vrot.slane %v3736_v31, 7  ;;  %v3739_v14 = vshll.u32 %v3493_v52, 16  ;;  %v5754_v52 = vld [vmem:[%s6990_s4 + $0x1b8] sm:$0xff]  }
 0x413   : > { %v3809_v0 = vshrl.u32 %v3660_v21, 16  ;;  %5396 = vmatprep.subr.bf16.mxu1 %v5740_v33  ;;  %v3777_v62 = vrot.slane %v3775_v38, 7  ;;  %v3778_v32 = vshll.u32 %v3577_v51, 16  ;;  %v3814_v35 = vshrl.u32 %v3661_v48, 16  ;;  %v5755_v33 = vld [vmem:[%s6990_s4 + $0x200] sm:$0xff]  }
 0x414   : > { %v3702_v56 = vor.u32 %v3700_v29, %v3699_v16  ;;  %v5089_v50 = vrot.slane %v3731_v47, 9  ;;  %v3741_v57 = vor.u32 %v3739_v14, %v3738_v36  ;;  %v5092_v1 = vrot.slane %v3770_v37, 9  ;;  %v5763_v19 = vld [vmem:[#allocation3 + $0x14] ss:$0 sps:$4 sm:$0x77]   ;;  %v5757_v36 = vld [vmem:[%s6990_s4 + $0x210] sm:$0xff]  }
 0x415   : > { %5375 = vmatpush3.bf16.msra.mxu0 %v5741_v41  ;;  %v3780_v28 = vor.u32 %v3778_v32, %v3777_v62  ;;  %v3816_v4 = vrot.slane %v3814_v35, 7  ;;  %v3817_v40 = vshll.u32 %v3661_v48, 16  ;;  %v5095_v39 = vrot.slane %v3809_v0, 9  ;;  %v5765_v24 = vld [vmem:[#allocation3 + $0x24] ss:$0 sps:$4 sm:$0x77]  }
 0x416   : > { %v3703_v42 = vsel %vm6083_vm11, %v5086_v63, %v3702_v56  ;;  %5397 = vmatpush3.bf16.msra.mxu1 %v5742_v55  ;;  %5376 = vmatprep.subr.bf16.mxu0 %v5743_v58  ;;  %v3742_v60 = vsel %vm6083_vm11, %v5089_v50, %v3741_v57  ;;  %v5764_v43 = vld [vmem:[#allocation3 + $0x1c] ss:$0 sps:$4 sm:$0x77]   ;;  %v3341_v51 = vrot.slane %v5766_v18, 5  ;;  %v3338_v53 = vrot.slane %v5763_v19, 5  ;;  %v5756_v41 = vld [vmem:[%s6990_s4 + $0x208] sm:$0xff]  }
 0x417   : > { %5398 = vmatprep.subr.bf16.mxu1 %v5744_v26  ;;  %v3781_v7 = vsel %vm6083_vm11, %v5092_v1, %v3780_v28  ;;  %v3819_v22 = vor.u32 %v3817_v40, %v3816_v4  ;;  %v4021_v8 = vcombine.low %v3703_v42, %v3742_v60  ;;  %v4022_v6 = vcombine.high %v3703_v42, %v3742_v60  ;;  %v5758_v57 = vld [vmem:[%s6990_s4 + $0x218] sm:$0xff]  }
 0x418   : > { %v3340_v21 = vrot.slane %v5765_v24, 5  ;;  %v3339_v54 = vrot.slane %v5764_v43, 5  ;;  %v3662_v47 = vcombine.high %v3341_v51, %v3341_v51  ;;  %v3410_v31 = vcombine.high %v3338_v53, %v3338_v53 }
 0x419   : > { %5377 = vmatpush3.bf16.msra.mxu0 %v5745_v46  ;;  %v3820_v59 = vsel %vm6083_vm11, %v5095_v39, %v3819_v22  ;;  %v4031_v61 = vrot.slane %v4021_v8, %v5891_v15  ;;  %v4038_v27 = vrot.slane %v4022_v6, %v5891_v15  ;;  %v3669_v29 = vrot.slane %v3341_v51, %v5891_v15  ;;  %v5759_v39 = vld [vmem:[%s6990_s4 + $0x220] sm:$0xff]  }
 0x41a   : > { %5399 = vmatpush3.bf16.msra.mxu1 %v5746_v3  ;;  %5378 = vmatprep.subr.bf16.mxu0 %v5747_v5  ;;  %v4023_v20 = vcombine.low %v3781_v7, %v3820_v59  ;;  %v4024_v25 = vcombine.high %v3781_v7, %v3820_v59  ;;  %v3578_v37 = vcombine.high %v3340_v21, %v3340_v21 }
 0x41b   : > { %5400 = vmatprep.subr.bf16.mxu1 %v5748_v49  ;;  %v3494_v16 = vcombine.high %v3339_v54, %v3339_v54  ;;  %v3676_v38 = vrot.slane %v3662_v47, %v5891_v15  ;;  %v3424_v55 = vrot.slane %v3410_v31, %v5891_v15  ;;  %v3417_v63 = vrot.slane %v3338_v53, %v5891_v15 }
 0x41c   : > { %v4045_v44 = vrot.slane %v4023_v20, %v5891_v15  ;;  %v4052_v45 = vrot.slane %v4024_v25, %v5891_v15  ;;  %v3592_v58 = vrot.slane %v3578_v37, %v5891_v15  ;;  %v3585_v0 = vrot.slane %v3340_v21, %v5891_v15 }
 0x41d   : > { %5379 = vmatpush3.bf16.msra.mxu0 %v5749_v13  ;;  %v3508_v14 = vrot.slane %v3494_v16, %v5891_v15  ;;  %v3677_v26 = vcombine.high %v3669_v29, %v3669_v29  ;;  %v3827_v56 = vshrl.u32 %v3676_v38, 16  ;;  %v3501_v62 = vrot.slane %v3339_v54, %v5891_v15 }
 0x41e   : > { %5401 = vmatpush3.bf16.msra.mxu1 %v5750_v23  ;;  %5380 = vmatprep.subr.bf16.mxu0 %v5751_v12  ;;  %v4054_v9 = vcombine.high %v4031_v61, %v4045_v44  ;;  %v4056_v34 = vcombine.high %v4038_v27, %v4052_v45  ;;  %v4053_v11 = vcombine.low %v4031_v61, %v4045_v44  ;;  %v3710_v32 = vshrl.u32 %v3424_v55, 16  ;;  %v5760_v61 = vld [vmem:[%s6990_s4 + $0x228] sm:$0xff]  }
 0x41f   : > { %5402 = vmatprep.subr.bf16.mxu1 %v5752_v17  ;;  %v4055_v48 = vcombine.low %v4038_v27, %v4052_v45  ;;  %v3788_v35 = vshrl.u32 %v3592_v58, 16  ;;  %v3425_v50 = vcombine.high %v3417_v63, %v3417_v63  ;;  %v3593_v1 = vcombine.high %v3585_v0, %v3585_v0  ;;  %v5761_v45 = vld [vmem:[%s6990_s4 + $0x230] sm:$0xff]  }
 0x420   : > { %4629 = vmatprep.mubr.bf16.mxu0 %v4054_v9  ;;  %4670 = vmatprep.mubr.bf16.mxu1 %v4056_v34  ;;  %v3749_v46 = vshrl.u32 %v3508_v14, 16  ;;  %v3822_v42 = vshrl.u32 %v3677_v26, 16  ;;  %v3829_v28 = vrot.slane %v3827_v56, 7  ;;  %v3830_v4 = vshll.u32 %v3676_v38, 16  ;;  %v5762_v9 = vld [vmem:[%s6990_s4 + $0x238] sm:$0xff]  }
 0x421   : > { %5381 = vmatpush3.bf16.msra.mxu0 %v5753_v30  ;;  %v3509_v40 = vcombine.high %v3501_v62, %v3501_v62  ;;  %v3712_v3 = vrot.slane %v3710_v32, 7  ;;  %v3790_v5 = vrot.slane %v3788_v35, 7  ;;  %v3705_v60 = vshrl.u32 %v3425_v50, 16 }
 0x422   : > { %5403 = vmatpush3.bf16.msra.mxu1 %v5754_v52  ;;  %5451 = vmatprep.subr.bf16.mxu0 %v5775_v2  ;;  %v3713_v49 = vshll.u32 %v3424_v55, 16  ;;  %v3751_v7 = vrot.slane %v3749_v46, 7  ;;  %v3783_v22 = vshrl.u32 %v3593_v1, 16  ;;  %v3791_v8 = vshll.u32 %v3592_v58, 16 }
 0x423   : > { %v5096_v6 = vrot.slane %v3822_v42, 9  ;;  %v3832_v13 = vor.u32 %v3830_v4, %v3829_v28  ;;  %v3744_v23 = vshrl.u32 %v3509_v40, 16  ;;  %v3752_v12 = vshll.u32 %v3508_v14, 16 }
 0x424   : > { %4630 = vmatmul.mubr.bf16.vlgmr.msra.gmra.mrb[20].mxu0 %v4053_v11  ;;  %v3715_v59 = vor.u32 %v3713_v49, %v3712_v3  ;;  %v3793_v20 = vor.u32 %v3791_v8, %v3790_v5  ;;  %v5087_v25 = vrot.slane %v3705_v60, 9  ;;  %v5093_v17 = vrot.slane %v3783_v22, 9 }
 0x425   : > { %4671 = vmatmul.mubr.bf16.vlgmr.msra.gmra.mrb[20].mxu1 %v4055_v48  ;;  %5452 = vmatpush3.bf16.msra.mxu0 %v5755_v33  ;;  %v3754_v27 = vor.u32 %v3752_v12, %v3751_v7  ;;  %v5090_v19 = vrot.slane %v3744_v23, 9  ;;  %v3833_v44 = vsel %vm6083_vm11, %v5096_v6, %v3832_v13  ;;  %v5097_v33 = vld [vmem:[%s6994_s8] ss:$0 sm:$0xff] }
 0x426   : > { %5467 = vmatprep.mubr.msk.bf16.mxu0 %vm5778_vm0, %v5775_v2  ;;  %5453 = vmatprep.subr.bf16.mxu0 %v5775_v2  ;;  %v3716_v18 = vsel %vm6083_vm11, %v5087_v25, %v3715_v59  ;;  %v3794_v24 = vsel %vm6083_vm11, %v5093_v17, %v3793_v20 }
 0x427   : > { %v3755_v30 = vsel %vm6083_vm11, %v5090_v19, %v3754_v27  ;;  %v4058_v43 = vcombine.low %v3794_v24, %v3833_v44 }
 0x428   : > { %v4057_v52 = vcombine.low %v3716_v18, %v3755_v30 }
 0x429   : > { %5454 = vmatpush3.bf16.msra.mxu0 %v5756_v41  ;;  %v4072_v51 = vrot.slane %v4058_v43, %v5891_v15 }
 0x42a   : > { %5455 = vmatprep.subr.bf16.mxu0 %v5775_v2  ;;  %v4065_v34 = vrot.slane %v4057_v52, %v5891_v15 }
 0x42c   : > { %v4073_v53 = vcombine.low %v4065_v34, %v4072_v51 }
 0x42d   : > { %5456 = vmatpush3.bf16.msra.mxu0 %v5757_v36 }
 0x42e   : > { %5457 = vmatprep.subr.bf16.mxu0 %v5775_v2 }
 0x431   : > { %5458 = vmatpush3.bf16.msra.mxu0 %v5758_v57 }
 0x432   : > { %5459 = vmatprep.subr.bf16.mxu0 %v5775_v2 }
 0x435   : > { %5460 = vmatpush3.bf16.msra.mxu0 %v5759_v39 }
 0x436   : > { %5461 = vmatprep.subr.bf16.mxu0 %v5775_v2 }
 0x439   : > { %5462 = vmatpush3.bf16.msra.mxu0 %v5760_v61 }
 0x43a   : > { %5463 = vmatprep.subr.bf16.mxu0 %v5775_v2 }
 0x43d   : > { %5464 = vmatpush3.bf16.msra.mxu0 %v5761_v45 }
 0x43e   : > { %5465 = vmatprep.subr.bf16.mxu0 %v5775_v2 }
 0x441   : > { %5466 = vmatpush3.bf16.msra.mxu0 %v5762_v9 }
 0x444   : > { %5468 = vmatmul.mubr.bf16.vlgmr.msra.gmra.mrb[24].mxu0 %v4073_v53 }
 0x4d7   : > { %v5338_v10 = vpop.f32.mrb[16].mxu0  ;;  %v5360_v21 = vpop.f32.mrb[16].mxu1 }
 0x4d8   : > { %v5339_v54 = vpop.f32.mrb[17].mxu0  ;;  %v5361_v11 = vpop.f32.mrb[17].mxu1 }
 0x4d9   : > { %v5340_v48 = vadd.f32 %v5339_v54, %v5338_v10  ;;  %v5362_v47 = vadd.f32 %v5361_v11, %v5360_v21  ;;  %v5341_v31 = vpop.f32.mrb[18].mxu0  ;;  %v5363_v37 = vpop.f32.mrb[18].mxu1 }
 0x4da   : > { %v5342_v2 = vpop.f32.mrb[19].mxu0  ;;  %v5364_v41 = vpop.f32.mrb[19].mxu1 }
 0x4db   : > { %v4550_v16 = vadd.f32 %v5340_v48, %v5097_v33  ;;  %v5343_v29 = vadd.f32 %v5342_v2, %v5341_v31  ;;  %v5365_v38 = vadd.f32 %v5364_v41, %v5363_v37 }
 0x4dd   : > { %v4591_v55 = vadd.f32 %v5362_v47, %v4550_v16  ;;  %v4553_v58 = vadd.f32 %v5343_v29, %v5097_v33 }
 0x4df   : > { %v4594_v63 = vadd.f32 %v5365_v38, %v4553_v58 }
 0x4f7   : > { %v5382_v36 = vpop.f32.mrb[20].mxu0 }
 0x4f8   : > { %v5404_v14 = vpop.f32.mrb[20].mxu1  ;;  %v5383_v0 = vpop.f32.mrb[21].mxu0 }
 0x4f9   : > { %v5405_v26 = vpop.f32.mrb[21].mxu1  ;;  %v5384_v56 = vadd.f32 %v5383_v0, %v5382_v36  ;;  %v5385_v32 = vpop.f32.mrb[22].mxu0 }
 0x4fa   : > { %v5406_v62 = vadd.f32 %v5405_v26, %v5404_v14  ;;  %v5407_v35 = vpop.f32.mrb[22].mxu1  ;;  %v5386_v50 = vpop.f32.mrb[23].mxu0 }
 0x4fb   : > { %v5408_v57 = vpop.f32.mrb[23].mxu1  ;;  %v4632_v1 = vadd.f32 %v5384_v56, %v4591_v55  ;;  %v5387_v46 = vadd.f32 %v5386_v50, %v5385_v32 }
 0x4fc   : > { %v5409_v42 = vadd.f32 %v5408_v57, %v5407_v35 }
 0x4fd   : > { %v4635_v28 = vadd.f32 %v5387_v46, %v4594_v63  ;;  %v4673_v4 = vadd.f32 %v5406_v62, %v4632_v1 }
 0x4ff   : > { %v4676_v40 = vadd.f32 %v5409_v42, %v4635_v28 }
 0x517   : > { %v4713_v3 = vpop.f32.mrb[24].mxu0 }
 0x518   : > { %v4714_v5 = vadd.f32 %v4713_v3, %v4673_v4  ;;  %v5469_v60 = vpop.f32.mrb[25].mxu0 }
 0x519   : > { %v4716_v39 = vpop.f32.mrb[26].mxu0 }
 0x51a   : > { %v4717_v49 = vadd.f32 %v4716_v39, %v4676_v40  ;;  %v5470_v7 = vpop.f32.mrb[27].mxu0  ;;  %v4720_v22 = vmax.f32 %v4714_v5, 0.0 }
 0x51c   : > { %v4721_v8 = vmax.f32 %v4717_v49, 0.0 }
 0x51e   : > { %v4722_v6 = vpack.c.bf16 %v4721_v8, %v4720_v22  ;;  %v5170_v13 = vpack.c.bf16 %v4721_v8, %v4721_v8 }
 0x520   : > { %v4731_v59 = vrot.slane %v4722_v6, %v5891_v15  ;;  %v4738_v23 = vrot.slane %v5170_v13, %v5891_v15  ;;  %5171 = vst.sshfl [vmem:[%s332_s28] sm:$0x3 pattern:$0x76325410] %v4722_v6 }
 0x521   : > { %5172 = vst.sshfl [vmem:[%s332_s28 + $0x4] sm:$0x3 pattern:$0x76325410] %v5170_v13 }
 0x522   : > { %v4739_v12 = vcombine.high %v4731_v59, %v4731_v59  ;;  %v4740_v20 = vcombine.high %v4738_v23, %v4738_v23 }
 0x524   : > { %4746 = vst [vmem:[%s332_s28 + $0x2] sm:$0x3] %v4739_v12  ;;  %4748 = vst [vmem:[%s332_s28 + $0x6] sm:$0x3] %v4740_v20 }
 0x525 PF: > { %s19_s30 = sadd.s32 1, %s5773_s30  }
 0x526   : > { %p16_p4 = scmp.ge.s32.totalorder %s19_s30, 4  }
 0x528   :  { %18 = sbr.rel (!%p16_p4) target bundleno = 1 (0x1), region = 91 }

</bundles_post_ra>
